<compile_context>
chip_gen: v7x
topology: tpu7x:2x2x1
jax: 0.10.0
libtpu: 0.0.40
codegen_flags: <defaults>
</compile_context>

<pallas_src>
import jax
import jax.numpy as jnp
from jax.experimental import pallas as pl
from jax.experimental.pallas import tpu as pltpu

_LN_EPS = 1e-5
_INV_SQRT2 = 0.7071067811865476


def _basin_kernel(x_ref, gamma_ref, beta_ref,
                  w1_ref, b1_ref, w2_ref, b2_ref,
                  wg_ref, bg_ref, o_ref):
    # x_ref: (tm, dim) tile of tokens; weights/biases are broadcast (resident).
    identity = x_ref[...].astype(jnp.float32)
    mxu_dt = w1_ref.dtype  # bf16 (default) or f32

    # --- LayerNorm over the feature (lane) axis, f32 ---
    mean = jnp.mean(identity, axis=-1, keepdims=True)
    centered = identity - mean
    var = jnp.mean(centered * centered, axis=-1, keepdims=True)
    xn = centered * jax.lax.rsqrt(var + _LN_EPS)
    xn = xn * gamma_ref[...] + beta_ref[...]

    # --- FF: Linear(dim, 4*dim) -> exact GELU -> Linear(4*dim, dim) ---
    # MXU operands in mxu_dt, accumulation in f32.
    h = jnp.dot(xn.astype(mxu_dt), w1_ref[...],
                preferred_element_type=jnp.float32) + b1_ref[...]
    h = 0.5 * h * (1.0 + jax.lax.erf(h * _INV_SQRT2))   # exact GELU (PyTorch default)
    ff = jnp.dot(h.astype(mxu_dt), w2_ref[...],
                 preferred_element_type=jnp.float32) + b2_ref[...]

    # --- Gate on the identity path ---
    g = jax.nn.sigmoid(
        jnp.dot(identity.astype(mxu_dt), wg_ref[...],
                preferred_element_type=jnp.float32) + bg_ref[...]
    )

    o_ref[...] = (identity + g * ff).astype(o_ref.dtype)


def linear_basin_block(x, params, *, tm=256, mxu_dtype=jnp.bfloat16):
    """x: (batch, seq, dim) float32. Returns same shape/dtype.

    tm: token-tile rows (multiple of 8; 256 default, sized for v6e/v7x MXU M-dim).
    mxu_dtype: dtype of the matmul operands (bf16 default; jnp.float32 for exact
               parity with the f32 PyTorch reference).
    """
    batch, seq, dim = x.shape
    assert tm % 8 == 0, "token tile must be a multiple of 8 sublanes"
    n = batch * seq
    hidden = params["w1"].shape[1]  # 4 * dim

    # Pad token count up to a multiple of tm (grid = cdiv). Padded rows are
    # zeros (LayerNorm stays finite thanks to eps) and are sliced off after.
    n_pad = tm * pl.cdiv(n, tm)
    x2d = x.reshape(n, dim)
    if n_pad != n:
        x2d = jnp.pad(x2d, ((0, n_pad - n), (0, 0)))

    # Heavy matmul weights stored in the MXU dtype; small vectors stay f32.
    w1 = params["w1"].astype(mxu_dtype)
    w2 = params["w2"].astype(mxu_dtype)
    wg = params["wg"].astype(mxu_dtype)
    gamma = params["gamma"].astype(jnp.float32)
    beta = params["beta"].astype(jnp.float32)
    b1 = params["b1"].astype(jnp.float32)
    b2 = params["b2"].astype(jnp.float32)
    bg = params["bg"].astype(jnp.float32)

    row_spec = pl.BlockSpec((tm, dim), lambda i: (i, 0))
    # Constant-index (grid-invariant) blocks: single-buffer them — Pallas skips
    # the re-DMA anyway, and this halves their VMEM footprint.
    def const(shape):
        return pl.BlockSpec(shape, lambda i: (0,) * len(shape),
                            pipeline_mode=pl.Buffered(1))

    # --- VMEM budget (per core): resident weights + double-buffered x/out tiles
    #     + f32 intermediates, with headroom. ---
    w_bytes = int(w1.size * w1.dtype.itemsize
                  + w2.size * w2.dtype.itemsize
                  + wg.size * wg.dtype.itemsize)
    small_bytes = 4 * (4 * dim + hidden)            # gamma, beta, b1, b2, bg (f32)
    io_bytes = 2 * 2 * tm * dim * x.dtype.itemsize  # double-buffered x & out tiles
    interm_bytes = 4 * tm * hidden + 4 * 4 * tm * dim
    vmem_budget = int(1.25 * (w_bytes + small_bytes + io_bytes + interm_bytes)) + (4 << 20)
    vmem_budget = min(max(vmem_budget, 16 << 20), 100 << 20)
    # TODO(synk): for very large dim (18*dim^2 bytes of bf16 weights > ~40 MiB on
    # v7x's 64 MiB VMEM), add a hidden-dim grid axis splitting w1/w2 with an f32
    # accumulator scratch marked "arbitrary".

    # --- Advisory cost estimate for the XLA scheduler ---
    flops = 2 * n_pad * (dim * hidden + hidden * dim + dim * dim)
    cost = pl.CostEstimate(
        flops=flops,
        transcendentals=n_pad * (hidden + dim),     # erf over (n, 4d) + sigmoid over (n, d)
        bytes_accessed=2 * n_pad * dim * x.dtype.itemsize + w_bytes + small_bytes,
    )

    out2d = pl.pallas_call(
        _basin_kernel,
        out_shape=jax.ShapeDtypeStruct((n_pad, dim), x.dtype),
        grid_spec=pltpu.PrefetchScalarGridSpec(
            num_scalar_prefetch=0,
            grid=(n_pad // tm,),
            in_specs=[
                row_spec,                 # x tile
                const((1, dim)),          # gamma
                const((1, dim)),          # beta
                const((dim, hidden)),     # w1
                const((1, hidden)),       # b1
                const((hidden, dim)),     # w2
                const((1, dim)),          # b2
                const((dim, dim)),        # wg
                const((1, dim)),          # bg
            ],
            out_specs=row_spec,
        ),
        compiler_params=pltpu.CompilerParams(
            dimension_semantics=("parallel",),   # shards token tiles across TCs (v7x)
            vmem_limit_bytes=vmem_budget,
        ),
        cost_estimate=cost,
    )(x2d, gamma, beta, w1, b1, w2, b2, wg, bg)

    if n_pad != n:
        out2d = out2d[:n]
    return out2d.reshape(batch, seq, dim)


def init_params(key, dim):
    """Deterministic synthetic init matching the module's parameter shapes."""
    hidden = 4 * dim
    ks = jax.random.split(key, 6)
    scale = lambda fan_in: 1.0 / jnp.sqrt(fan_in)
    return {
        "gamma": jnp.ones((1, dim), jnp.float32),
        "beta": jnp.zeros((1, dim), jnp.float32),
        "w1": jax.random.uniform(ks[0], (dim, hidden), jnp.float32, -scale(dim), scale(dim)),
        "b1": jax.random.uniform(ks[1], (1, hidden), jnp.float32, -scale(dim), scale(dim)),
        "w2": jax.random.uniform(ks[2], (hidden, dim), jnp.float32, -scale(hidden), scale(hidden)),
        "b2": jax.random.uniform(ks[3], (1, dim), jnp.float32, -scale(hidden), scale(hidden)),
        "wg": jax.random.uniform(ks[4], (dim, dim), jnp.float32, -scale(dim), scale(dim)),
        "bg": jax.random.uniform(ks[5], (1, dim), jnp.float32, -scale(dim), scale(dim)),
    }


def _reference(x, p):
    """Pure-JAX f32 reference for sanity checking."""
    mean = jnp.mean(x, axis=-1, keepdims=True)
    var = jnp.mean((x - mean) ** 2, axis=-1, keepdims=True)
    xn = (x - mean) / jnp.sqrt(var + _LN_EPS) * p["gamma"][0] + p["beta"][0]
    h = xn @ p["w1"] + p["b1"][0]
    h = 0.5 * h * (1.0 + jax.lax.erf(h * _INV_SQRT2))
    ff = h @ p["w2"] + p["b2"][0]
    g = jax.nn.sigmoid(x @ p["wg"] + p["bg"][0])
    return x + g * ff


if __name__ == "__main__":
    key = jax.random.PRNGKey(0)
    k_x1, k_x2, k_p1, k_p2 = jax.random.split(key, 4)

    # --- Small shape consistent with the module (exercises padding: 16 -> 256 rows) ---
    batch, seq, dim = 2, 8, 32
    x = jax.random.normal(k_x1, (batch, seq, dim), jnp.float32)
    params = init_params(k_p1, dim)
    ref = _reference(x, params)

    # f32 MXU path: exact parity with the f32 reference.
    out_f32 = jax.block_until_ready(
        linear_basin_block(x, params, mxu_dtype=jnp.float32))
    assert out_f32.shape == x.shape and out_f32.dtype == x.dtype
    assert jnp.allclose(out_f32, ref, atol=1e-5, rtol=1e-5), "f32 path mismatch"

    # bf16 MXU path (default / fast): small, expected numerical drift.
    out_bf16 = jax.block_until_ready(linear_basin_block(x, params))
    assert out_bf16.shape == x.shape and out_bf16.dtype == x.dtype
    assert jnp.allclose(out_bf16, ref, atol=5e-2, rtol=5e-2), "bf16 path mismatch"

    # --- Slightly larger, lane-dense dim; multi-step grid + ragged last tile ---
    batch2, seq2, dim2 = 2, 200, 128   # n=400 -> padded to 512 with tm=256
    x2 = jax.random.normal(k_x2, (batch2, seq2, dim2), jnp.float32)
    params2 = init_params(k_p2, dim2)
    ref2 = _reference(x2, params2)
    out2 = jax.block_until_ready(linear_basin_block(x2, params2))
    assert out2.shape == x2.shape
    assert jnp.allclose(out2, ref2, atol=5e-2, rtol=5e-2), "bf16 path mismatch (dim=128)"

    print("KERNEL_OK")
</pallas_src>

<mosaic_0001>
module attributes {stable_mosaic.version = 11 : i64} {
  func.func @_basin_kernel(%arg0: i32, %arg1: memref<256x32xf32, #tpu.memory_space<vmem>>, %arg2: memref<1x32xf32, #tpu.memory_space<vmem>>, %arg3: memref<1x32xf32, #tpu.memory_space<vmem>>, %arg4: memref<32x128xf32, #tpu.memory_space<vmem>>, %arg5: memref<1x128xf32, #tpu.memory_space<vmem>>, %arg6: memref<128x32xf32, #tpu.memory_space<vmem>>, %arg7: memref<1x32xf32, #tpu.memory_space<vmem>>, %arg8: memref<32x32xf32, #tpu.memory_space<vmem>>, %arg9: memref<1x32xf32, #tpu.memory_space<vmem>>, %arg10: memref<256x32xf32, #tpu.memory_space<vmem>>) attributes {dimension_semantics = [#tpu.dimension_semantics<parallel>], iteration_bounds = array<i64: 1>, scalar_prefetch = 0 : i64, scratch_operands = 0 : i64, tpu.core_type = #tpu.core_type<tc>, window_params = [{transform_indices = @transform_0, window_bounds = array<i64: 256, 32>}, {pipeline_mode = #tpu.pipeline_mode<synchronous>, transform_indices = @transform_1, window_bounds = array<i64: 1, 32>}, {pipeline_mode = #tpu.pipeline_mode<synchronous>, transform_indices = @transform_2, window_bounds = array<i64: 1, 32>}, {pipeline_mode = #tpu.pipeline_mode<synchronous>, transform_indices = @transform_3, window_bounds = array<i64: 32, 128>}, {pipeline_mode = #tpu.pipeline_mode<synchronous>, transform_indices = @transform_4, window_bounds = array<i64: 1, 128>}, {pipeline_mode = #tpu.pipeline_mode<synchronous>, transform_indices = @transform_5, window_bounds = array<i64: 128, 32>}, {pipeline_mode = #tpu.pipeline_mode<synchronous>, transform_indices = @transform_6, window_bounds = array<i64: 1, 32>}, {pipeline_mode = #tpu.pipeline_mode<synchronous>, transform_indices = @transform_7, window_bounds = array<i64: 32, 32>}, {pipeline_mode = #tpu.pipeline_mode<synchronous>, transform_indices = @transform_8, window_bounds = array<i64: 1, 32>}, {transform_indices = @transform_9, window_bounds = array<i64: 256, 32>}]} {
    %c0 = arith.constant 0 : index
    %c0_0 = arith.constant 0 : index
    %0 = vector.load %arg1[%c0, %c0_0] : memref<256x32xf32, #tpu.memory_space<vmem>>, vector<256x32xf32>
    %cst = arith.constant dense<0.000000e+00> : vector<256xf32>
    %1 = vector.multi_reduction <add>, %0, %cst [1] : vector<256x32xf32> to vector<256xf32>
    %2 = vector.shape_cast %1 : vector<256xf32> to vector<256x1xf32>
    %cst_1 = arith.constant 3.200000e+01 : f32
    %3 = vector.broadcast %cst_1 : f32 to vector<256x1xf32>
    %4 = arith.divf %2, %3 : vector<256x1xf32>
    %5 = vector.broadcast %4 : vector<256x1xf32> to vector<256x32xf32>
    %6 = arith.subf %0, %5 : vector<256x32xf32>
    %7 = arith.mulf %6, %6 : vector<256x32xf32>
    %cst_2 = arith.constant dense<0.000000e+00> : vector<256xf32>
    %8 = vector.multi_reduction <add>, %7, %cst_2 [1] : vector<256x32xf32> to vector<256xf32>
    %9 = vector.shape_cast %8 : vector<256xf32> to vector<256x1xf32>
    %cst_3 = arith.constant 3.200000e+01 : f32
    %10 = vector.broadcast %cst_3 : f32 to vector<256x1xf32>
    %11 = arith.divf %9, %10 : vector<256x1xf32>
    %cst_4 = arith.constant 9.99999974E-6 : f32
    %12 = vector.broadcast %cst_4 : f32 to vector<256x1xf32>
    %13 = arith.addf %11, %12 : vector<256x1xf32>
    %14 = math.rsqrt %13 : vector<256x1xf32>
    %15 = vector.broadcast %14 : vector<256x1xf32> to vector<256x32xf32>
    %16 = arith.mulf %6, %15 : vector<256x32xf32>
    %c0_5 = arith.constant 0 : index
    %c0_6 = arith.constant 0 : index
    %17 = vector.load %arg2[%c0_5, %c0_6] : memref<1x32xf32, #tpu.memory_space<vmem>>, vector<1x32xf32>
    %18 = vector.broadcast %17 : vector<1x32xf32> to vector<256x32xf32>
    %19 = arith.mulf %16, %18 : vector<256x32xf32>
    %c0_7 = arith.constant 0 : index
    %c0_8 = arith.constant 0 : index
    %20 = vector.load %arg3[%c0_7, %c0_8] : memref<1x32xf32, #tpu.memory_space<vmem>>, vector<1x32xf32>
    %21 = vector.broadcast %20 : vector<1x32xf32> to vector<256x32xf32>
    %22 = arith.addf %19, %21 : vector<256x32xf32>
    %c0_9 = arith.constant 0 : index
    %c0_10 = arith.constant 0 : index
    %23 = vector.load %arg4[%c0_9, %c0_10] : memref<32x128xf32, #tpu.memory_space<vmem>>, vector<32x128xf32>
    %cst_11 = arith.constant dense<0.000000e+00> : vector<256x128xf32>
    %24 = tpu.matmul %22, %23, %cst_11 {dimension_numbers = #tpu.dot_dimension_numbers<[1], [0], [0], [1], [0, 0, 1, 1], [], []>} : vector<256x32xf32>, vector<32x128xf32>, vector<256x128xf32> -> vector<256x128xf32>
    %c0_12 = arith.constant 0 : index
    %c0_13 = arith.constant 0 : index
    %25 = vector.load %arg5[%c0_12, %c0_13] : memref<1x128xf32, #tpu.memory_space<vmem>>, vector<1x128xf32>
    %26 = vector.broadcast %25 : vector<1x128xf32> to vector<256x128xf32>
    %27 = arith.addf %24, %26 : vector<256x128xf32>
    %cst_14 = arith.constant 5.000000e-01 : f32
    %28 = vector.broadcast %cst_14 : f32 to vector<256x128xf32>
    %29 = arith.mulf %28, %27 : vector<256x128xf32>
    %cst_15 = arith.constant 0.707106769 : f32
    %30 = vector.broadcast %cst_15 : f32 to vector<256x128xf32>
    %31 = arith.mulf %27, %30 : vector<256x128xf32>
    %32 = math.erf %31 : vector<256x128xf32>
    %cst_16 = arith.constant 1.000000e+00 : f32
    %33 = vector.broadcast %cst_16 : f32 to vector<256x128xf32>
    %34 = arith.addf %33, %32 : vector<256x128xf32>
    %35 = arith.mulf %29, %34 : vector<256x128xf32>
    %c0_17 = arith.constant 0 : index
    %c0_18 = arith.constant 0 : index
    %36 = vector.load %arg6[%c0_17, %c0_18] : memref<128x32xf32, #tpu.memory_space<vmem>>, vector<128x32xf32>
    %cst_19 = arith.constant dense<0.000000e+00> : vector<256x32xf32>
    %37 = tpu.matmul %35, %36, %cst_19 {dimension_numbers = #tpu.dot_dimension_numbers<[1], [0], [0], [1], [0, 0, 1, 1], [], []>} : vector<256x128xf32>, vector<128x32xf32>, vector<256x32xf32> -> vector<256x32xf32>
    %c0_20 = arith.constant 0 : index
    %c0_21 = arith.constant 0 : index
    %38 = vector.load %arg7[%c0_20, %c0_21] : memref<1x32xf32, #tpu.memory_space<vmem>>, vector<1x32xf32>
    %39 = vector.broadcast %38 : vector<1x32xf32> to vector<256x32xf32>
    %40 = arith.addf %37, %39 : vector<256x32xf32>
    %c0_22 = arith.constant 0 : index
    %c0_23 = arith.constant 0 : index
    %41 = vector.load %arg8[%c0_22, %c0_23] : memref<32x32xf32, #tpu.memory_space<vmem>>, vector<32x32xf32>
    %cst_24 = arith.constant dense<0.000000e+00> : vector<256x32xf32>
    %42 = tpu.matmul %0, %41, %cst_24 {dimension_numbers = #tpu.dot_dimension_numbers<[1], [0], [0], [1], [0, 0, 1, 1], [], []>} : vector<256x32xf32>, vector<32x32xf32>, vector<256x32xf32> -> vector<256x32xf32>
    %c0_25 = arith.constant 0 : index
    %c0_26 = arith.constant 0 : index
    %43 = vector.load %arg9[%c0_25, %c0_26] : memref<1x32xf32, #tpu.memory_space<vmem>>, vector<1x32xf32>
    %44 = vector.broadcast %43 : vector<1x32xf32> to vector<256x32xf32>
    %45 = arith.addf %42, %44 : vector<256x32xf32>
    %46 = arith.negf %45 : vector<256x32xf32>
    %47 = math.exp %46 : vector<256x32xf32>
    %cst_27 = arith.constant 1.000000e+00 : f32
    %48 = vector.broadcast %cst_27 : f32 to vector<256x32xf32>
    %49 = arith.addf %48, %47 : vector<256x32xf32>
    %50 = arith.divf %48, %49 : vector<256x32xf32>
    %51 = arith.mulf %50, %40 : vector<256x32xf32>
    %52 = arith.addf %0, %51 : vector<256x32xf32>
    %c0_28 = arith.constant 0 : index
    %c0_29 = arith.constant 0 : index
    %53 = vector.load %arg10[%c0_28, %c0_29] : memref<256x32xf32, #tpu.memory_space<vmem>>, vector<256x32xf32>
    tpu.vector_store %arg10[%c0_28, %c0_29], %52 {strides = array<i32>} : memref<256x32xf32, #tpu.memory_space<vmem>>, vector<256x32xf32>,
    return
  }
  func.func @transform_0(%arg0: i32) -> (i32, i32) {
    %c0_i32 = arith.constant 0 : i32
    %c0_i32_0 = arith.constant 0 : i32
    return %arg0, %c0_i32 : i32, i32
  }
  func.func @transform_1(%arg0: i32) -> (i32, i32) {
    %c0_i32 = arith.constant 0 : i32
    %c0_i32_0 = arith.constant 0 : i32
    %c0_i32_1 = arith.constant 0 : i32
    return %c0_i32, %c0_i32_0 : i32, i32
  }
  func.func @transform_2(%arg0: i32) -> (i32, i32) {
    %c0_i32 = arith.constant 0 : i32
    %c0_i32_0 = arith.constant 0 : i32
    %c0_i32_1 = arith.constant 0 : i32
    return %c0_i32, %c0_i32_0 : i32, i32
  }
  func.func @transform_3(%arg0: i32) -> (i32, i32) {
    %c0_i32 = arith.constant 0 : i32
    %c0_i32_0 = arith.constant 0 : i32
    %c0_i32_1 = arith.constant 0 : i32
    return %c0_i32, %c0_i32_0 : i32, i32
  }
  func.func @transform_4(%arg0: i32) -> (i32, i32) {
    %c0_i32 = arith.constant 0 : i32
    %c0_i32_0 = arith.constant 0 : i32
    %c0_i32_1 = arith.constant 0 : i32
    return %c0_i32, %c0_i32_0 : i32, i32
  }
  func.func @transform_5(%arg0: i32) -> (i32, i32) {
    %c0_i32 = arith.constant 0 : i32
    %c0_i32_0 = arith.constant 0 : i32
    %c0_i32_1 = arith.constant 0 : i32
    return %c0_i32, %c0_i32_0 : i32, i32
  }
  func.func @transform_6(%arg0: i32) -> (i32, i32) {
    %c0_i32 = arith.constant 0 : i32
    %c0_i32_0 = arith.constant 0 : i32
    %c0_i32_1 = arith.constant 0 : i32
    return %c0_i32, %c0_i32_0 : i32, i32
  }
  func.func @transform_7(%arg0: i32) -> (i32, i32) {
    %c0_i32 = arith.constant 0 : i32
    %c0_i32_0 = arith.constant 0 : i32
    %c0_i32_1 = arith.constant 0 : i32
    return %c0_i32, %c0_i32_0 : i32, i32
  }
  func.func @transform_8(%arg0: i32) -> (i32, i32) {
    %c0_i32 = arith.constant 0 : i32
    %c0_i32_0 = arith.constant 0 : i32
    %c0_i32_1 = arith.constant 0 : i32
    return %c0_i32, %c0_i32_0 : i32, i32
  }
  func.func @transform_9(%arg0: i32) -> (i32, i32) {
    %c0_i32 = arith.constant 0 : i32
    %c0_i32_0 = arith.constant 0 : i32
    return %arg0, %c0_i32 : i32, i32
  }
}

</mosaic_0001>

<bundles_post_ra>
// kernel: tpu_custom_call.1
= control target key start
LH: loop header
LB: loop body
LE: loop exit
PB: predicated region body
PF: predicated region fallthrough
CT: control target
= control target key end

     0   :  { %vm64_vm0 = vcmask 261120   ;;  %s4032_s0 = inlined_call_operand.vmem [shape: f32[256,32], index: 0, kind: input, shape index: {}]   ;;  %s4033_s3 = inlined_call_operand.vmem [shape: f32[32,128], index: 3, kind: input, shape index: {}]   ;;  %s4034_s7 = inlined_call_operand.vmem [shape: f32[32,32], index: 7, kind: input, shape index: {}]   ;;  %s4035_s5 = inlined_call_operand.vmem [shape: f32[128,32], index: 5, kind: input, shape index: {}]   ;;  %s4036_s1 = inlined_call_operand.vmem [shape: f32[1,32], index: 1, kind: input, shape index: {}]   ;;  %s4037_s2 = inlined_call_operand.vmem [shape: f32[1,32], index: 2, kind: input, shape index: {}]   ;;  %s4038_s4 = inlined_call_operand.vmem [shape: f32[1,128], index: 4, kind: input, shape index: {}]   ;;  %s4039_s8 = inlined_call_operand.vmem [shape: f32[1,32], index: 8, kind: input, shape index: {}]   ;;  %s4040_s6 = inlined_call_operand.vmem [shape: f32[1,32], index: 6, kind: input, shape index: {}]   ;;  %s4041_s9 = inlined_call_operand.vmem [shape: f32[256,32], index: 9, kind: output, shape index: {}]  }
   0x1   :  { %v2762_v0 = vld [vmem:[%s4032_s0] sm:$0xff]  ;;  %v2767_v1 = vld [vmem:[%s4032_s0 + $0x10] sm:$0xff]  ;;  %v2772_v2 = vld [vmem:[%s4032_s0 + $0x8] sm:$0xff] }
   0x2   :  { %v65_v3 = vsel %vm64_vm0, %v2762_v0, 0.0  ;;  %v71_v4 = vsel %vm64_vm0, %v2767_v1, 0.0  ;;  %v2781_v5 = vld [vmem:[%s4032_s0 + $0x18] sm:$0xff]  ;;  %v68_v6 = vsel %vm64_vm0, %v2772_v2, 0.0  ;;  %v2790_v8 = vld [vmem:[%s4032_s0 + $0x20] sm:$0xff]  ;;  %v2795_v9 = vld [vmem:[%s4032_s0 + $0x28] sm:$0xff] }
   0x3   :  { %66 = vadd.xlane.f32.xlu0 %v65_v3  ;;  %72 = vadd.xlane.f32.xlu1 %v71_v4  ;;  %v74_v7 = vsel %vm64_vm0, %v2781_v5, 0.0  ;;  %v77_v10 = vsel %vm64_vm0, %v2790_v8, 0.0  ;;  %v80_v11 = vsel %vm64_vm0, %v2795_v9, 0.0  ;;  %v2804_v12 = vld [vmem:[%s4032_s0 + $0x30] sm:$0xff]  ;;  %v2809_v13 = vld [vmem:[%s4032_s0 + $0x38] sm:$0xff]  ;;  %v2818_v16 = vld [vmem:[%s4032_s0 + $0x40] sm:$0xff] }
   0x4   :  { %v83_v14 = vsel %vm64_vm0, %v2804_v12, 0.0  ;;  %v86_v15 = vsel %vm64_vm0, %v2809_v13, 0.0  ;;  %v2823_v17 = vld [vmem:[%s4032_s0 + $0x48] sm:$0xff]  ;;  %v89_v18 = vsel %vm64_vm0, %v2818_v16, 0.0  ;;  %v2832_v20 = vld [vmem:[%s4032_s0 + $0x50] sm:$0xff]  ;;  %v2837_v21 = vld [vmem:[%s4032_s0 + $0x58] sm:$0xff] }
   0x5   :  { %v92_v19 = vsel %vm64_vm0, %v2823_v17, 0.0  ;;  %v95_v22 = vsel %vm64_vm0, %v2832_v20, 0.0  ;;  %v98_v23 = vsel %vm64_vm0, %v2837_v21, 0.0  ;;  %v2846_v24 = vld [vmem:[%s4032_s0 + $0x60] sm:$0xff]  ;;  %v2851_v25 = vld [vmem:[%s4032_s0 + $0x68] sm:$0xff]  ;;  %v2860_v28 = vld [vmem:[%s4032_s0 + $0x70] sm:$0xff] }
   0x6   :  { %v101_v26 = vsel %vm64_vm0, %v2846_v24, 0.0  ;;  %v104_v27 = vsel %vm64_vm0, %v2851_v25, 0.0  ;;  %v2865_v29 = vld [vmem:[%s4032_s0 + $0x78] sm:$0xff]  ;;  %v107_v30 = vsel %vm64_vm0, %v2860_v28, 0.0  ;;  %v2874_v32 = vld [vmem:[%s4032_s0 + $0x80] sm:$0xff]  ;;  %v2879_v33 = vld [vmem:[%s4032_s0 + $0x88] sm:$0xff] }
   0x7   :  { %69 = vadd.xlane.f32.xlu0 %v68_v6  ;;  %75 = vadd.xlane.f32.xlu1 %v74_v7  ;;  %v110_v31 = vsel %vm64_vm0, %v2865_v29, 0.0  ;;  %v113_v34 = vsel %vm64_vm0, %v2874_v32, 0.0  ;;  %v116_v35 = vsel %vm64_vm0, %v2879_v33, 0.0  ;;  %v2888_v36 = vld [vmem:[%s4032_s0 + $0x90] sm:$0xff]  ;;  %v2893_v37 = vld [vmem:[%s4032_s0 + $0x98] sm:$0xff]  ;;  %v2902_v40 = vld [vmem:[%s4032_s0 + $0xa0] sm:$0xff] }
   0x8   :  { %v119_v38 = vsel %vm64_vm0, %v2888_v36, 0.0  ;;  %v122_v39 = vsel %vm64_vm0, %v2893_v37, 0.0  ;;  %v2907_v41 = vld [vmem:[%s4032_s0 + $0xa8] sm:$0xff]  ;;  %v125_v42 = vsel %vm64_vm0, %v2902_v40, 0.0  ;;  %v2916_v44 = vld [vmem:[%s4032_s0 + $0xb0] sm:$0xff]  ;;  %v2921_v45 = vld [vmem:[%s4032_s0 + $0xb8] sm:$0xff] }
   0x9   :  { %v128_v43 = vsel %vm64_vm0, %v2907_v41, 0.0  ;;  %v131_v46 = vsel %vm64_vm0, %v2916_v44, 0.0  ;;  %v134_v47 = vsel %vm64_vm0, %v2921_v45, 0.0  ;;  %v2930_v48 = vld [vmem:[%s4032_s0 + $0xc0] sm:$0xff]  ;;  %v2935_v49 = vld [vmem:[%s4032_s0 + $0xc8] sm:$0xff]  ;;  %v2944_v52 = vld [vmem:[%s4032_s0 + $0xd0] sm:$0xff] }
   0xa   :  { %v137_v50 = vsel %vm64_vm0, %v2930_v48, 0.0  ;;  %v140_v51 = vsel %vm64_vm0, %v2935_v49, 0.0  ;;  %v2949_v53 = vld [vmem:[%s4032_s0 + $0xd8] sm:$0xff]  ;;  %v143_v54 = vsel %vm64_vm0, %v2944_v52, 0.0  ;;  %v2958_v56 = vld [vmem:[%s4032_s0 + $0xe0] sm:$0xff]  ;;  %v2963_v57 = vld [vmem:[%s4032_s0 + $0xe8] sm:$0xff] }
   0xb   :  { %78 = vadd.xlane.f32.xlu0 %v77_v10  ;;  %81 = vadd.xlane.f32.xlu1 %v80_v11  ;;  %v146_v55 = vsel %vm64_vm0, %v2949_v53, 0.0  ;;  %v149_v58 = vsel %vm64_vm0, %v2958_v56, 0.0  ;;  %v152_v59 = vsel %vm64_vm0, %v2963_v57, 0.0  ;;  %v2972_v60 = vld [vmem:[%s4032_s0 + $0xf0] sm:$0xff]  ;;  %v2977_v61 = vld [vmem:[%s4032_s0 + $0xf8] sm:$0xff] }
   0xc   :  { %v155_v62 = vsel %vm64_vm0, %v2972_v60, 0.0  ;;  %v158_v63 = vsel %vm64_vm0, %v2977_v61, 0.0 }
   0xf   :  { %84 = vadd.xlane.f32.xlu0 %v83_v14  ;;  %87 = vadd.xlane.f32.xlu1 %v86_v15 }
  0x13   :  { %90 = vadd.xlane.f32.xlu0 %v89_v18  ;;  %93 = vadd.xlane.f32.xlu1 %v92_v19 }
  0x17   :  { %96 = vadd.xlane.f32.xlu0 %v95_v22  ;;  %99 = vadd.xlane.f32.xlu1 %v98_v23 }
  0x1b   :  { %102 = vadd.xlane.f32.xlu0 %v101_v26  ;;  %105 = vadd.xlane.f32.xlu1 %v104_v27 }
  0x1f   :  { %108 = vadd.xlane.f32.xlu0 %v107_v30  ;;  %111 = vadd.xlane.f32.xlu1 %v110_v31 }
  0x23   :  { %114 = vadd.xlane.f32.xlu0 %v113_v34  ;;  %117 = vadd.xlane.f32.xlu1 %v116_v35 }
  0x27   :  { %120 = vadd.xlane.f32.xlu0 %v119_v38  ;;  %123 = vadd.xlane.f32.xlu1 %v122_v39 }
  0x2b   :  { %126 = vadd.xlane.f32.xlu0 %v125_v42  ;;  %129 = vadd.xlane.f32.xlu1 %v128_v43 }
  0x2f   :  { %132 = vadd.xlane.f32.xlu0 %v131_v46  ;;  %135 = vadd.xlane.f32.xlu1 %v134_v47 }
  0x33   :  { %138 = vadd.xlane.f32.xlu0 %v137_v50  ;;  %141 = vadd.xlane.f32.xlu1 %v140_v51 }
  0x37   :  { %144 = vadd.xlane.f32.xlu0 %v143_v54  ;;  %147 = vadd.xlane.f32.xlu1 %v146_v55 }
  0x3b   :  { %150 = vadd.xlane.f32.xlu0 %v149_v58  ;;  %153 = vadd.xlane.f32.xlu1 %v152_v59 }
  0x3f   :  { %156 = vadd.xlane.f32.xlu0 %v155_v62  ;;  %159 = vadd.xlane.f32.xlu1 %v158_v63 }
  0x90   :  { %v67_v3 = vpop.xlane.xlu0 %66  ;;  %v73_v4 = vpop.xlane.xlu1 %72 }
  0x91   :  { %v162_v6 = vmul.f32 0.03125, %v67_v3  ;;  %v164_v7 = vmul.f32 0.03125, %v73_v4 }
  0x93   :  { %v2984_v10 = vsub.f32 %v2762_v0, %v162_v6  ;;  %v2987_v11 = vsub.f32 %v2767_v1, %v164_v7 }
  0x94   :  { %v70_v14 = vpop.xlane.xlu0 %69  ;;  %v76_v15 = vpop.xlane.xlu1 %75 }
  0x95   :  { %v163_v18 = vmul.f32 0.03125, %v70_v14  ;;  %v165_v19 = vmul.f32 0.03125, %v76_v15  ;;  %v226_v22 = vmul.f32 %v2984_v10, %v2984_v10  ;;  %v228_v23 = vmul.f32 %v2987_v11, %v2987_v11 }
  0x97   :  { %v2994_v26 = vsub.f32 %v2772_v2, %v163_v18  ;;  %v2997_v27 = vsub.f32 %v2781_v5, %v165_v19  ;;  %v258_v0 = vsel %vm64_vm0, %v226_v22, 0.0  ;;  %v264_v31 = vsel %vm64_vm0, %v228_v23, 0.0 }
  0x98   :  { %259 = vadd.xlane.f32.xlu0 %v258_v0  ;;  %v79_v1 = vpop.xlane.xlu0 %78  ;;  %v82_v30 = vpop.xlane.xlu1 %81 }
  0x99   :  { %v166_v34 = vmul.f32 0.03125, %v79_v1  ;;  %v167_v35 = vmul.f32 0.03125, %v82_v30  ;;  %v227_v38 = vmul.f32 %v2994_v26, %v2994_v26  ;;  %v229_v39 = vmul.f32 %v2997_v27, %v2997_v27 }
  0x9b   :  { %v3006_v2 = vsub.f32 %v2790_v8, %v166_v34  ;;  %v3009_v5 = vsub.f32 %v2795_v9, %v167_v35  ;;  %v261_v42 = vsel %vm64_vm0, %v227_v38, 0.0  ;;  %v267_v47 = vsel %vm64_vm0, %v229_v39, 0.0 }
  0x9c   :  { %265 = vadd.xlane.f32.xlu0 %v264_v31  ;;  %262 = vadd.xlane.f32.xlu1 %v261_v42  ;;  %v85_v43 = vpop.xlane.xlu0 %84  ;;  %v88_v46 = vpop.xlane.xlu1 %87 }
  0x9d   :  { %v168_v50 = vmul.f32 0.03125, %v85_v43  ;;  %v169_v51 = vmul.f32 0.03125, %v88_v46  ;;  %v230_v54 = vmul.f32 %v3006_v2, %v3006_v2  ;;  %v231_v8 = vmul.f32 %v3009_v5, %v3009_v5 }
  0x9f   :  { %v3018_v55 = vsub.f32 %v2804_v12, %v168_v50  ;;  %v3021_v9 = vsub.f32 %v2809_v13, %v169_v51  ;;  %v270_v58 = vsel %vm64_vm0, %v230_v54, 0.0  ;;  %v273_v63 = vsel %vm64_vm0, %v231_v8, 0.0 }
  0xa0   :  { %268 = vadd.xlane.f32.xlu1 %v267_v47  ;;  %271 = vadd.xlane.f32.xlu0 %v270_v58  ;;  %v91_v59 = vpop.xlane.xlu0 %90  ;;  %v94_v62 = vpop.xlane.xlu1 %93 }
  0xa1   :  { %v170_v3 = vmul.f32 0.03125, %v91_v59  ;;  %v171_v4 = vmul.f32 0.03125, %v94_v62  ;;  %v232_v6 = vmul.f32 %v3018_v55, %v3018_v55  ;;  %v233_v12 = vmul.f32 %v3021_v9, %v3021_v9 }
  0xa3   :  { %v3030_v7 = vsub.f32 %v2818_v16, %v170_v3  ;;  %v3033_v13 = vsub.f32 %v2823_v17, %v171_v4  ;;  %v276_v14 = vsel %vm64_vm0, %v232_v6, 0.0  ;;  %v279_v19 = vsel %vm64_vm0, %v233_v12, 0.0 }
  0xa4   :  { %274 = vadd.xlane.f32.xlu1 %v273_v63  ;;  %277 = vadd.xlane.f32.xlu0 %v276_v14  ;;  %v97_v15 = vpop.xlane.xlu0 %96  ;;  %v100_v18 = vpop.xlane.xlu1 %99 }
  0xa5   :  { %v172_v22 = vmul.f32 0.03125, %v97_v15  ;;  %v173_v23 = vmul.f32 0.03125, %v100_v18  ;;  %v234_v0 = vmul.f32 %v3030_v7, %v3030_v7  ;;  %v235_v16 = vmul.f32 %v3033_v13, %v3033_v13 }
  0xa7   :  { %v3042_v1 = vsub.f32 %v2832_v20, %v172_v22  ;;  %v3045_v17 = vsub.f32 %v2837_v21, %v173_v23  ;;  %v282_v30 = vsel %vm64_vm0, %v234_v0, 0.0  ;;  %v285_v35 = vsel %vm64_vm0, %v235_v16, 0.0 }
  0xa8   :  { %280 = vadd.xlane.f32.xlu1 %v279_v19  ;;  %283 = vadd.xlane.f32.xlu0 %v282_v30  ;;  %v103_v31 = vpop.xlane.xlu0 %102  ;;  %v106_v34 = vpop.xlane.xlu1 %105 }
  0xa9   :  { %v174_v38 = vmul.f32 0.03125, %v103_v31  ;;  %v175_v39 = vmul.f32 0.03125, %v106_v34  ;;  %v236_v42 = vmul.f32 %v3042_v1, %v3042_v1  ;;  %v237_v20 = vmul.f32 %v3045_v17, %v3045_v17  ;;  %v561_v31 = vld [vmem:[%s4033_s3 + $0x8] sm:$0xff] }
  0xab   :  { %v3054_v43 = vsub.f32 %v2846_v24, %v174_v38  ;;  %v3057_v21 = vsub.f32 %v2851_v25, %v175_v39  ;;  %v288_v46 = vsel %vm64_vm0, %v236_v42, 0.0  ;;  %v291_v51 = vsel %vm64_vm0, %v237_v20, 0.0 }
  0xac   :  { %286 = vadd.xlane.f32.xlu1 %v285_v35  ;;  %289 = vadd.xlane.f32.xlu0 %v288_v46  ;;  %v109_v47 = vpop.xlane.xlu0 %108  ;;  %v112_v50 = vpop.xlane.xlu1 %111 }
  0xad   :  { %v176_v54 = vmul.f32 0.03125, %v109_v47  ;;  %v177_v8 = vmul.f32 0.03125, %v112_v50  ;;  %v238_v58 = vmul.f32 %v3054_v43, %v3054_v43  ;;  %v239_v24 = vmul.f32 %v3057_v21, %v3057_v21 }
  0xaf   :  { %v3066_v59 = vsub.f32 %v2860_v28, %v176_v54  ;;  %v3069_v25 = vsub.f32 %v2865_v29, %v177_v8  ;;  %v294_v62 = vsel %vm64_vm0, %v238_v58, 0.0  ;;  %v297_v4 = vsel %vm64_vm0, %v239_v24, 0.0  ;;  %v563_v54 = vld [vmem:[%s4033_s3 + $0x18] sm:$0xff] }
  0xb0   :  { %292 = vadd.xlane.f32.xlu1 %v291_v51  ;;  %295 = vadd.xlane.f32.xlu0 %v294_v62  ;;  %v115_v63 = vpop.xlane.xlu0 %114  ;;  %v118_v3 = vpop.xlane.xlu1 %117 }
  0xb1   :  { %v178_v6 = vmul.f32 0.03125, %v115_v63  ;;  %v179_v12 = vmul.f32 0.03125, %v118_v3  ;;  %v240_v14 = vmul.f32 %v3066_v59, %v3066_v59  ;;  %v241_v28 = vmul.f32 %v3069_v25, %v3069_v25 }
  0xb3   :  { %v3078_v15 = vsub.f32 %v2874_v32, %v178_v6  ;;  %v3081_v29 = vsub.f32 %v2879_v33, %v179_v12  ;;  %v300_v18 = vsel %vm64_vm0, %v240_v14, 0.0  ;;  %v303_v23 = vsel %vm64_vm0, %v241_v28, 0.0  ;;  %v560_v33 = vld [vmem:[%s4033_s3] sm:$0xff] }
  0xb4   :  { %298 = vadd.xlane.f32.xlu1 %v297_v4  ;;  %301 = vadd.xlane.f32.xlu0 %v300_v18  ;;  %v121_v19 = vpop.xlane.xlu0 %120  ;;  %v124_v22 = vpop.xlane.xlu1 %123  ;;  %v2337_v34 = vpack.c.bf16 %v561_v31, %v560_v33 }
  0xb5   :  { %v180_v0 = vmul.f32 0.03125, %v121_v19  ;;  %v181_v16 = vmul.f32 0.03125, %v124_v22  ;;  %v242_v30 = vmul.f32 %v3078_v15, %v3078_v15  ;;  %v243_v32 = vmul.f32 %v3081_v29, %v3081_v29 }
  0xb6   :  { %2338 = vmatprep.subr.bf16.mxu0 %v2337_v34  ;;  %2385 = vmatprep.subr.bf16.mxu1 %v2337_v34 }
  0xb7   :  { %v3096_v35 = vsub.f32 %v2888_v36, %v180_v0  ;;  %v3099_v38 = vsub.f32 %v2893_v37, %v181_v16  ;;  %v306_v39 = vsel %vm64_vm0, %v242_v30, 0.0  ;;  %v309_v46 = vsel %vm64_vm0, %v243_v32, 0.0  ;;  %v562_v37 = vld [vmem:[%s4033_s3 + $0x10] sm:$0xff]  ;;  %2340 = vmatpush3.bf16.msra.mxu0 %v2337_v34  ;;  %2387 = vmatpush3.bf16.msra.mxu1 %v2337_v34 }
  0xb8   :  { %304 = vadd.xlane.f32.xlu1 %v303_v23  ;;  %307 = vadd.xlane.f32.xlu0 %v306_v39  ;;  %v127_v42 = vpop.xlane.xlu0 %126  ;;  %v130_v20 = vpop.xlane.xlu1 %129  ;;  %v2341_v8 = vpack.c.bf16 %v563_v54, %v562_v37 }
  0xb9   :  { %v182_v47 = vmul.f32 0.03125, %v127_v42  ;;  %v183_v50 = vmul.f32 0.03125, %v130_v20  ;;  %v244_v51 = vmul.f32 %v3096_v35, %v3096_v35  ;;  %v245_v36 = vmul.f32 %v3099_v38, %v3099_v38 }
  0xba   :  { %2342 = vmatprep.subr.bf16.mxu0 %v2341_v8  ;;  %2386 = vmatprep.subr.bf16.mxu1 %v2341_v8 }
  0xbb   :  { %v3114_v58 = vsub.f32 %v2902_v40, %v182_v47  ;;  %v3117_v24 = vsub.f32 %v2907_v41, %v183_v50  ;;  %v312_v62 = vsel %vm64_vm0, %v244_v51, 0.0  ;;  %v315_v4 = vsel %vm64_vm0, %v245_v36, 0.0  ;;  %2344 = vmatpush3.bf16.msra.mxu0 %v2341_v8  ;;  %2388 = vmatpush3.bf16.msra.mxu1 %v2341_v8 }
  0xbc   :  { %310 = vadd.xlane.f32.xlu1 %v309_v46  ;;  %313 = vadd.xlane.f32.xlu0 %v312_v62  ;;  %v133_v63 = vpop.xlane.xlu0 %132  ;;  %v136_v3 = vpop.xlane.xlu1 %135 }
  0xbd   :  { %v184_v6 = vmul.f32 0.03125, %v133_v63  ;;  %v185_v12 = vmul.f32 0.03125, %v136_v3  ;;  %v246_v14 = vmul.f32 %v3114_v58, %v3114_v58  ;;  %v247_v40 = vmul.f32 %v3117_v24, %v3117_v24 }
  0xbf   :  { %v3126_v41 = vsub.f32 %v2916_v44, %v184_v6  ;;  %v3129_v28 = vsub.f32 %v2921_v45, %v185_v12  ;;  %v318_v18 = vsel %vm64_vm0, %v246_v14, 0.0  ;;  %v321_v23 = vsel %vm64_vm0, %v247_v40, 0.0 }
  0xc0   :  { %316 = vadd.xlane.f32.xlu1 %v315_v4  ;;  %319 = vadd.xlane.f32.xlu0 %v318_v18  ;;  %v139_v19 = vpop.xlane.xlu0 %138  ;;  %v142_v22 = vpop.xlane.xlu1 %141 }
  0xc1   :  { %v186_v0 = vmul.f32 0.03125, %v139_v19  ;;  %v187_v16 = vmul.f32 0.03125, %v142_v22  ;;  %v248_v30 = vmul.f32 %v3126_v41, %v3126_v41  ;;  %v249_v44 = vmul.f32 %v3129_v28, %v3129_v28 }
  0xc3   :  { %v3138_v32 = vsub.f32 %v2930_v48, %v186_v0  ;;  %v3141_v45 = vsub.f32 %v2935_v49, %v187_v16  ;;  %v324_v33 = vsel %vm64_vm0, %v248_v30, 0.0  ;;  %v327_v39 = vsel %vm64_vm0, %v249_v44, 0.0  ;;  %v1301_v44 = vld [vmem:[%s4034_s7 + $0x8] sm:$0xff] }
  0xc4   :  { %322 = vadd.xlane.f32.xlu1 %v321_v23  ;;  %325 = vadd.xlane.f32.xlu0 %v324_v33  ;;  %v145_v31 = vpop.xlane.xlu0 %144  ;;  %v148_v34 = vpop.xlane.xlu1 %147 }
  0xc5   :  { %v188_v42 = vmul.f32 0.03125, %v145_v31  ;;  %v189_v20 = vmul.f32 0.03125, %v148_v34  ;;  %v250_v46 = vmul.f32 %v3138_v32, %v3138_v32  ;;  %v251_v48 = vmul.f32 %v3141_v45, %v3141_v45  ;;  %v1052_v31 = vld [vmem:[%s4035_s5] sm:$0xff]  ;;  %v1053_v34 = vld [vmem:[%s4035_s5 + $0x8] sm:$0xff] }
  0xc7   :  { %v3150_v47 = vsub.f32 %v2944_v52, %v188_v42  ;;  %v3153_v49 = vsub.f32 %v2949_v53, %v189_v20  ;;  %v330_v50 = vsel %vm64_vm0, %v250_v46, 0.0  ;;  %v333_v37 = vsel %vm64_vm0, %v251_v48, 0.0 }
  0xc8   :  { %328 = vadd.xlane.f32.xlu1 %v327_v39  ;;  %331 = vadd.xlane.f32.xlu0 %v330_v50  ;;  %v151_v51 = vpop.xlane.xlu0 %150  ;;  %v154_v36 = vpop.xlane.xlu1 %153  ;;  %v3201_v39 = vpack.c.bf16 %v1053_v34, %v1052_v31  ;;  %v3214_v31 = vld [vmem:[%s4037_s2] ss:$0 sm:$0xff] }
  0xc9   :  { %v190_v54 = vmul.f32 0.03125, %v151_v51  ;;  %v191_v8 = vmul.f32 0.03125, %v154_v36  ;;  %v252_v62 = vmul.f32 %v3150_v47, %v3150_v47  ;;  %v253_v52 = vmul.f32 %v3153_v49, %v3153_v49 }
  0xca   :  { %2346 = vmatprep.subr.bf16.mxu1 %v3201_v39 }
  0xcb   :  { %v3162_v63 = vsub.f32 %v2958_v56, %v190_v54  ;;  %v3165_v53 = vsub.f32 %v2963_v57, %v191_v8  ;;  %v336_v3 = vsel %vm64_vm0, %v252_v62, 0.0  ;;  %v339_v12 = vsel %vm64_vm0, %v253_v52, 0.0 }
  0xcc   :  { %334 = vadd.xlane.f32.xlu1 %v333_v37  ;;  %337 = vadd.xlane.f32.xlu0 %v336_v3  ;;  %v157_v4 = vpop.xlane.xlu0 %156  ;;  %v160_v6 = vpop.xlane.xlu1 %159 }
  0xcd   :  { %v192_v14 = vmul.f32 0.03125, %v157_v4  ;;  %v193_v40 = vmul.f32 0.03125, %v160_v6  ;;  %v254_v18 = vmul.f32 %v3162_v63, %v3162_v63  ;;  %v255_v56 = vmul.f32 %v3165_v53, %v3165_v53 }
  0xcf   :  { %v3174_v19 = vsub.f32 %v2972_v60, %v192_v14  ;;  %v3177_v57 = vsub.f32 %v2977_v61, %v193_v40  ;;  %v342_v22 = vsel %vm64_vm0, %v254_v18, 0.0  ;;  %v345_v23 = vsel %vm64_vm0, %v255_v56, 0.0  ;;  %v1300_v61 = vld [vmem:[%s4034_s7] sm:$0xff] }
  0xd0   :  { %340 = vadd.xlane.f32.xlu1 %v339_v12  ;;  %343 = vadd.xlane.f32.xlu0 %v342_v22  ;;  %v3193_v33 = vpack.c.bf16 %v1301_v44, %v1300_v61 }
  0xd1   :  { %v256_v0 = vmul.f32 %v3174_v19, %v3174_v19  ;;  %v257_v16 = vmul.f32 %v3177_v57, %v3177_v57 }
  0xd2   :  { %2378 = vmatprep.subr.bf16.mxu0 %v3193_v33 }
  0xd3   :  { %v348_v30 = vsel %vm64_vm0, %v256_v0, 0.0  ;;  %v351_v60 = vsel %vm64_vm0, %v257_v16, 0.0  ;;  %v3208_v0 = vld [vmem:[%s4036_s1] ss:$0 sm:$0xff] }
  0xd4   :  { %346 = vadd.xlane.f32.xlu1 %v345_v23  ;;  %349 = vadd.xlane.f32.xlu0 %v348_v30 }
  0xd8   :  { %352 = vadd.xlane.f32.xlu1 %v351_v60 }
 0x125   :  { %v260_v42 = vpop.xlane.xlu0 %259 }
 0x126   :  { %v354_v20 = vmul.f32 0.03125, %v260_v42 }
 0x128   :  { %v386_v46 = vadd.f32 1e-05, %v354_v20 }
 0x129   :  { %v263_v48 = vpop.xlane.xlu1 %262  ;;  %v266_v50 = vpop.xlane.xlu0 %265 }
 0x12a   :  { %2389 = vrsqrt.f32 %v386_v46  ;;  %v355_v51 = vmul.f32 0.03125, %v263_v48  ;;  %v356_v36 = vmul.f32 0.03125, %v266_v50 }
 0x12c   :  { %v387_v37 = vadd.f32 1e-05, %v355_v51  ;;  %v388_v54 = vadd.f32 1e-05, %v356_v36 }
 0x12d   :  { %v269_v8 = vpop.xlane.xlu1 %268  ;;  %v272_v62 = vpop.xlane.xlu0 %271 }
 0x12e   :  { %2391 = vrsqrt.f32 %v387_v37  ;;  %v357_v52 = vmul.f32 0.03125, %v269_v8  ;;  %v358_v3 = vmul.f32 0.03125, %v272_v62  ;;  %v1302_v62 = vld [vmem:[%s4034_s7 + $0x10] sm:$0xff] }
 0x12f   :  { %2393 = vrsqrt.f32 %v388_v54 }
 0x130   :  { %v389_v4 = vadd.f32 1e-05, %v357_v52  ;;  %v390_v6 = vadd.f32 1e-05, %v358_v3  ;;  %v1303_v52 = vld [vmem:[%s4034_s7 + $0x18] sm:$0xff] }
 0x131   :  { %v275_v12 = vpop.xlane.xlu1 %274  ;;  %v278_v14 = vpop.xlane.xlu0 %277 }
 0x132   :  { %2395 = vrsqrt.f32 %v389_v4  ;;  %v359_v40 = vmul.f32 0.03125, %v275_v12  ;;  %v360_v18 = vmul.f32 0.03125, %v278_v14 }
 0x133   :  { %2397 = vrsqrt.f32 %v390_v6 }
 0x134   :  { %v2390_v56 = vpop.eup %2389  ;;  %v391_v22 = vadd.f32 1e-05, %v359_v40  ;;  %v392_v23 = vadd.f32 1e-05, %v360_v18 }
 0x135   :  { %v281_v16 = vpop.xlane.xlu1 %280  ;;  %v284_v30 = vpop.xlane.xlu0 %283  ;;  %v450_v60 = vmul.f32 %v2390_v56, %v2984_v10 }
 0x136   :  { %2399 = vrsqrt.f32 %v391_v22  ;;  %v361_v61 = vmul.f32 0.03125, %v281_v16  ;;  %v362_v44 = vmul.f32 0.03125, %v284_v30  ;;  %v2381_v22 = vpack.c.bf16 %v1303_v52, %v1302_v62 }
 0x137   :  { %2401 = vrsqrt.f32 %v392_v23  ;;  %v489_v34 = vmul.f32 %v3208_v0, %v450_v60 }
 0x138   :  { %v2392_v42 = vpop.eup %2391  ;;  %v393_v20 = vadd.f32 1e-05, %v361_v61  ;;  %v394_v46 = vadd.f32 1e-05, %v362_v44 }
 0x139   :  { %v2394_v48 = vpop.eup %2393  ;;  %v287_v50 = vpop.xlane.xlu1 %286  ;;  %v528_v36 = vadd.f32 %v3214_v31, %v489_v34  ;;  %v451_v10 = vmul.f32 %v2392_v42, %v2994_v26 }
 0x13a   :  { %v290_v51 = vpop.xlane.xlu0 %289  ;;  %2403 = vrsqrt.f32 %v393_v20  ;;  %v363_v37 = vmul.f32 0.03125, %v287_v50  ;;  %v452_v8 = vmul.f32 %v2394_v48, %v2987_v11 }
 0x13b   :  { %v364_v54 = vmul.f32 0.03125, %v290_v51  ;;  %2405 = vrsqrt.f32 %v394_v46  ;;  %2153 = vmatprep.mubr.msk.f32.mxu0 %vm64_vm0, %v528_v36  ;;  %v490_v3 = vmul.f32 %v3208_v0, %v451_v10 }
 0x13c   :  { %v2396_v4 = vpop.eup %2395  ;;  %v395_v26 = vadd.f32 1e-05, %v363_v37  ;;  %v491_v12 = vmul.f32 %v3208_v0, %v452_v8 }
 0x13d   :  { %v396_v6 = vadd.f32 1e-05, %v364_v54  ;;  %v2398_v14 = vpop.eup %2397  ;;  %v293_v11 = vpop.xlane.xlu1 %292  ;;  %v529_v18 = vadd.f32 %v3214_v31, %v490_v3  ;;  %v453_v56 = vmul.f32 %v2396_v4, %v2997_v27 }
 0x13e   :  { %v296_v40 = vpop.xlane.xlu0 %295  ;;  %2407 = vrsqrt.f32 %v395_v26  ;;  %v365_v23 = vmul.f32 0.03125, %v293_v11  ;;  %v530_v30 = vadd.f32 %v3214_v31, %v491_v12  ;;  %v454_v61 = vmul.f32 %v2398_v14, %v3006_v2 }
 0x13f   :  { %v366_v16 = vmul.f32 0.03125, %v296_v40  ;;  %2409 = vrsqrt.f32 %v396_v6  ;;  %2154 = vmatmul.mubr.msk.f32.vlgmr.msra.gmra.mrb[0].mxu0 %vm64_vm0, %v529_v18  ;;  %v492_v60 = vmul.f32 %v3208_v0, %v453_v56 }
 0x140   :  { %v2400_v44 = vpop.eup %2399  ;;  %v397_v34 = vadd.f32 1e-05, %v365_v23  ;;  %2156 = vmatprep.mubr.msk.f32.mxu0 %vm64_vm0, %v530_v30  ;;  %2380 = vmatpush3.bf16.msra.mxu0 %v3193_v33  ;;  %v493_v50 = vmul.f32 %v3208_v0, %v454_v61 }
 0x141   :  { %v398_v42 = vadd.f32 1e-05, %v366_v16  ;;  %v2402_v27 = vpop.eup %2401  ;;  %v299_v20 = vpop.xlane.xlu1 %298  ;;  %v531_v48 = vadd.f32 %v3214_v31, %v492_v60  ;;  %v455_v51 = vmul.f32 %v2400_v44, %v3009_v5  ;;  %2382 = vmatprep.subr.bf16.mxu0 %v2381_v22 }
 0x142   :  { %v302_v46 = vpop.xlane.xlu0 %301  ;;  %2411 = vrsqrt.f32 %v397_v34  ;;  %v367_v36 = vmul.f32 0.03125, %v299_v20  ;;  %v456_v10 = vmul.f32 %v2402_v27, %v3018_v55  ;;  %v532_v33 = vadd.f32 %v3214_v31, %v493_v50 }
 0x143   :  { %v368_v2 = vmul.f32 0.03125, %v302_v46  ;;  %2413 = vrsqrt.f32 %v398_v42  ;;  %2157 = vmatmul.mubr.msk.f32.gmra.mrb[2].mxu0 %vm64_vm0, %v531_v48  ;;  %v494_v37 = vmul.f32 %v3208_v0, %v455_v51 }
 0x144   :  { %v2404_v54 = vpop.eup %2403  ;;  %v399_v8 = vadd.f32 1e-05, %v367_v36  ;;  %v495_v52 = vmul.f32 %v3208_v0, %v456_v10  ;;  %2384 = vmatpush3.bf16.msra.mxu0 %v2381_v22  ;;  %2159 = vmatprep.mubr.msk.f32.mxu0 %vm64_vm0, %v532_v33 }
 0x145   :  { %v400_v62 = vadd.f32 1e-05, %v368_v2  ;;  %v2406_v5 = vpop.eup %2405  ;;  %v305_v3 = vpop.xlane.xlu1 %304  ;;  %v533_v55 = vadd.f32 %v3214_v31, %v494_v37  ;;  %v457_v26 = vmul.f32 %v2404_v54, %v3021_v9 }
 0x146   :  { %v308_v4 = vpop.xlane.xlu0 %307  ;;  %2415 = vrsqrt.f32 %v399_v8  ;;  %v369_v6 = vmul.f32 0.03125, %v305_v3  ;;  %v534_v14 = vadd.f32 %v3214_v31, %v495_v52  ;;  %v458_v40 = vmul.f32 %v2406_v5, %v3030_v7 }
 0x147   :  { %v370_v12 = vmul.f32 0.03125, %v308_v4  ;;  %2417 = vrsqrt.f32 %v400_v62  ;;  %2160 = vmatmul.mubr.msk.f32.gmra.mrb[4].mxu0 %vm64_vm0, %v533_v55  ;;  %v496_v11 = vmul.f32 %v3208_v0, %v457_v26 }
 0x148   :  { %v2408_v18 = vpop.eup %2407  ;;  %v401_v56 = vadd.f32 1e-05, %v369_v6  ;;  %2162 = vmatprep.mubr.msk.f32.mxu0 %vm64_vm0, %v534_v14  ;;  %v497_v60 = vmul.f32 %v3208_v0, %v458_v40 }
 0x149   :  { %v402_v22 = vadd.f32 1e-05, %v370_v12  ;;  %v2410_v23 = vpop.eup %2409  ;;  %v311_v16 = vpop.xlane.xlu1 %310  ;;  %v535_v30 = vadd.f32 %v3214_v31, %v496_v11  ;;  %v459_v61 = vmul.f32 %v2408_v18, %v3033_v13 }
 0x14a   :  { %v314_v9 = vpop.xlane.xlu0 %313  ;;  %2419 = vrsqrt.f32 %v401_v56  ;;  %v371_v44 = vmul.f32 0.03125, %v311_v16  ;;  %v460_v42 = vmul.f32 %v2410_v23, %v3042_v1  ;;  %v536_v7 = vadd.f32 %v3214_v31, %v497_v60 }
 0x14b   :  { %v372_v34 = vmul.f32 0.03125, %v314_v9  ;;  %2421 = vrsqrt.f32 %v402_v22  ;;  %2163 = vmatmul.mubr.msk.f32.gmra.mrb[6].mxu0 %vm64_vm0, %v535_v30  ;;  %v498_v27 = vmul.f32 %v3208_v0, %v459_v61 }
 0x14c   :  { %v2412_v20 = vpop.eup %2411  ;;  %v403_v46 = vadd.f32 1e-05, %v371_v44  ;;  %v499_v50 = vmul.f32 %v3208_v0, %v460_v42  ;;  %2165 = vmatprep.mubr.msk.f32.mxu0 %vm64_vm0, %v536_v7 }
 0x14d   :  { %v404_v48 = vadd.f32 1e-05, %v372_v34  ;;  %v2414_v51 = vpop.eup %2413  ;;  %v317_v13 = vpop.xlane.xlu1 %316  ;;  %v537_v2 = vadd.f32 %v3214_v31, %v498_v27  ;;  %v461_v1 = vmul.f32 %v2412_v20, %v3045_v17 }
 0x14e   :  { %v320_v36 = vpop.xlane.xlu0 %319  ;;  %2423 = vrsqrt.f32 %v403_v46  ;;  %v373_v10 = vmul.f32 0.03125, %v317_v13  ;;  %v538_v37 = vadd.f32 %v3214_v31, %v499_v50  ;;  %v462_v8 = vmul.f32 %v2414_v51, %v3054_v43 }
 0x14f   :  { %v374_v33 = vmul.f32 0.03125, %v320_v36  ;;  %2425 = vrsqrt.f32 %v404_v48  ;;  %2166 = vmatmul.mubr.msk.f32.gmra.mrb[8].mxu0 %vm64_vm0, %v537_v2  ;;  %v500_v54 = vmul.f32 %v3208_v0, %v461_v1 }
 0x150   :  { %v2416_v62 = vpop.eup %2415  ;;  %v405_v52 = vadd.f32 1e-05, %v373_v10  ;;  %2168 = vmatprep.mubr.msk.f32.mxu0 %vm64_vm0, %v538_v37  ;;  %v501_v26 = vmul.f32 %v3208_v0, %v462_v8  ;;  %v1055_v10 = vld [vmem:[%s4035_s5 + $0x18] sm:$0xff] }
 0x151   :  { %v406_v5 = vadd.f32 1e-05, %v374_v33  ;;  %v2418_v3 = vpop.eup %2417  ;;  %v323_v4 = vpop.xlane.xlu1 %322  ;;  %v539_v55 = vadd.f32 %v3214_v31, %v500_v54  ;;  %v463_v6 = vmul.f32 %v2416_v62, %v3057_v21  ;;  %v2645_v62 = vld [vmem:[%s4032_s0] sm:$0xff] }
 0x152   :  { %v326_v17 = vpop.xlane.xlu0 %325  ;;  %2427 = vrsqrt.f32 %v405_v52  ;;  %v375_v12 = vmul.f32 0.03125, %v323_v4  ;;  %v464_v11 = vmul.f32 %v2418_v3, %v3066_v59  ;;  %v540_v43 = vadd.f32 %v3214_v31, %v501_v26  ;;  %v1056_v26 = vld [vmem:[%s4035_s5 + $0x20] sm:$0xff] }
 0x153   :  { %v376_v14 = vmul.f32 0.03125, %v326_v17  ;;  %2429 = vrsqrt.f32 %v406_v5  ;;  %2169 = vmatmul.mubr.msk.f32.gmra.mrb[10].mxu0 %vm64_vm0, %v539_v55  ;;  %v502_v40 = vmul.f32 %v3208_v0, %v463_v6  ;;  %v1057_v6 = vld [vmem:[%s4035_s5 + $0x28] sm:$0xff] }
 0x154   :  { %v2420_v18 = vpop.eup %2419  ;;  %v407_v56 = vadd.f32 1e-05, %v375_v12  ;;  %v503_v23 = vmul.f32 %v3208_v0, %v464_v11  ;;  %2171 = vmatprep.mubr.msk.f32.mxu0 %vm64_vm0, %v540_v43 }
 0x155   :  { %v408_v22 = vadd.f32 1e-05, %v376_v14  ;;  %v2422_v16 = vpop.eup %2421  ;;  %v329_v21 = vpop.xlane.xlu1 %328  ;;  %v541_v30 = vadd.f32 %v3214_v31, %v502_v40  ;;  %v465_v59 = vmul.f32 %v2420_v18, %v3069_v25  ;;  %v2646_v40 = vld [vmem:[%s4032_s0 + $0x8] sm:$0xff] }
 0x156   :  { %v332_v9 = vpop.xlane.xlu0 %331  ;;  %2431 = vrsqrt.f32 %v407_v56  ;;  %v377_v60 = vmul.f32 0.03125, %v329_v21  ;;  %v542_v44 = vadd.f32 %v3214_v31, %v503_v23  ;;  %v466_v42 = vmul.f32 %v2422_v16, %v3078_v15  ;;  %v1054_v15 = vld [vmem:[%s4035_s5 + $0x10] sm:$0xff] }
 0x157   :  { %v378_v61 = vmul.f32 0.03125, %v332_v9  ;;  %2433 = vrsqrt.f32 %v408_v22  ;;  %2172 = vmatmul.mubr.msk.f32.gmra.mrb[12].mxu0 %vm64_vm0, %v541_v30  ;;  %v504_v34 = vmul.f32 %v3208_v0, %v465_v59  ;;  %v2349_v55 = vpack.c.bf16 %v1055_v10, %v1054_v15  ;;  %v2650_v15 = vld [vmem:[%s4032_s0 + $0x28] sm:$0xff] }
 0x158   :  { %v2424_v7 = vpop.eup %2423  ;;  %v409_v27 = vadd.f32 1e-05, %v377_v60  ;;  %2174 = vmatprep.mubr.msk.f32.mxu0 %vm64_vm0, %v542_v44  ;;  %v505_v51 = vmul.f32 %v3208_v0, %v466_v42  ;;  %v2353_v23 = vpack.c.bf16 %v1057_v6, %v1056_v26  ;;  %v2647_v60 = vld [vmem:[%s4032_s0 + $0x10] sm:$0xff] }
 0x159   :  { %v410_v20 = vadd.f32 1e-05, %v378_v61  ;;  %v2426_v46 = vpop.eup %2425  ;;  %v335_v48 = vpop.xlane.xlu1 %334  ;;  %v543_v50 = vadd.f32 %v3214_v31, %v504_v34  ;;  %v467_v13 = vmul.f32 %v2424_v7, %v3081_v29 }
 0x15a   :  { %v338_v25 = vpop.xlane.xlu0 %337  ;;  %2435 = vrsqrt.f32 %v409_v27  ;;  %v379_v36 = vmul.f32 0.03125, %v335_v48  ;;  %v468_v1 = vmul.f32 %v2426_v46, %v3096_v35  ;;  %v544_v33 = vadd.f32 %v3214_v31, %v505_v51 }
 0x15b   :  { %v380_v2 = vmul.f32 0.03125, %v338_v25  ;;  %2437 = vrsqrt.f32 %v410_v20  ;;  %2175 = vmatmul.mubr.msk.f32.gmra.mrb[14].mxu0 %vm64_vm0, %v543_v50  ;;  %v506_v29 = vmul.f32 %v3208_v0, %v467_v13 }
 0x15c   :  { %v2428_v37 = vpop.eup %2427  ;;  %v411_v54 = vadd.f32 1e-05, %v379_v36  ;;  %v507_v35 = vmul.f32 %v3208_v0, %v468_v1  ;;  %2289 = vmatprep.mubr.msk.f32.mxu0 %vm64_vm0, %v2645_v62  ;;  %2177 = vmatprep.mubr.msk.f32.mxu1 %vm64_vm0, %v544_v33 }
 0x15d   :  { %v412_v8 = vadd.f32 1e-05, %v380_v2  ;;  %v2430_v52 = vpop.eup %2429  ;;  %v341_v5 = vpop.xlane.xlu1 %340  ;;  %v545_v4 = vadd.f32 %v3214_v31, %v506_v29  ;;  %v469_v17 = vmul.f32 %v2428_v37, %v3099_v38 }
 0x15e   :  { %v344_v3 = vpop.xlane.xlu0 %343  ;;  %2439 = vrsqrt.f32 %v411_v54  ;;  %v381_v12 = vmul.f32 0.03125, %v341_v5  ;;  %v546_v11 = vadd.f32 %v3214_v31, %v507_v35  ;;  %v470_v38 = vmul.f32 %v2430_v52, %v3114_v58  ;;  %v2651_v54 = vld [vmem:[%s4032_s0 + $0x30] sm:$0xff]  ;;  %v2652_v52 = vld [vmem:[%s4032_s0 + $0x38] sm:$0xff] }
 0x15f   :  { %v382_v14 = vmul.f32 0.03125, %v344_v3  ;;  %2441 = vrsqrt.f32 %v412_v8  ;;  %2178 = vmatmul.mubr.msk.f32.vlgmr.msra.gmra.mrb[0].mxu1 %vm64_vm0, %v545_v4  ;;  %v508_v43 = vmul.f32 %v3208_v0, %v469_v17  ;;  %2290 = vmatmul.mubr.msk.f32.vlgmr.msra.gmra.mrb[16].mxu0 %vm64_vm0, %v2646_v40  ;;  %v2653_v3 = vld [vmem:[%s4032_s0 + $0x40] sm:$0xff] }
 0x160   :  { %v2432_v18 = vpop.eup %2431  ;;  %v413_v56 = vadd.f32 1e-05, %v381_v12  ;;  %2180 = vmatprep.mubr.msk.f32.mxu1 %vm64_vm0, %v546_v11  ;;  %2348 = vmatpush3.bf16.msra.mxu1 %v3201_v39  ;;  %v509_v58 = vmul.f32 %v3208_v0, %v470_v38  ;;  %v2654_v12 = vld [vmem:[%s4032_s0 + $0x48] sm:$0xff] }
 0x161   :  { %v414_v22 = vadd.f32 1e-05, %v382_v14  ;;  %v2434_v16 = vpop.eup %2433  ;;  %v347_v21 = vpop.xlane.xlu1 %346  ;;  %v547_v30 = vadd.f32 %v3214_v31, %v508_v43  ;;  %v471_v59 = vmul.f32 %v2432_v18, %v3117_v24  ;;  %2350 = vmatprep.subr.bf16.mxu1 %v2349_v55  ;;  %2292 = vmatprep.mubr.msk.f32.mxu0 %vm64_vm0, %v2647_v60  ;;  %v2648_v24 = vld [vmem:[%s4032_s0 + $0x18] sm:$0xff]  ;;  %v2661_v60 = vld [vmem:[%s4032_s0 + $0x80] sm:$0xff] }
 0x162   :  { %v350_v9 = vpop.xlane.xlu0 %349  ;;  %2443 = vrsqrt.f32 %v413_v56  ;;  %v383_v61 = vmul.f32 0.03125, %v347_v21  ;;  %v472_v44 = vmul.f32 %v2434_v16, %v3126_v41  ;;  %v548_v34 = vadd.f32 %v3214_v31, %v509_v58  ;;  %v2649_v41 = vld [vmem:[%s4032_s0 + $0x20] sm:$0xff]  ;;  %v2658_v58 = vld [vmem:[%s4032_s0 + $0x68] sm:$0xff] }
 0x163   :  { %v384_v39 = vmul.f32 0.03125, %v350_v9  ;;  %2445 = vrsqrt.f32 %v414_v22  ;;  %2181 = vmatmul.mubr.msk.f32.gmra.mrb[2].mxu1 %vm64_vm0, %v547_v30  ;;  %v510_v42 = vmul.f32 %v3208_v0, %v471_v59  ;;  %2293 = vmatmul.mubr.msk.f32.gmra.mrb[18].mxu0 %vm64_vm0, %v2648_v24  ;;  %v2656_v22 = vld [vmem:[%s4032_s0 + $0x58] sm:$0xff]  ;;  %v2659_v59 = vld [vmem:[%s4032_s0 + $0x70] sm:$0xff] }
 0x164   :  { %v2436_v7 = vpop.eup %2435  ;;  %v415_v27 = vadd.f32 1e-05, %v383_v61  ;;  %v511_v46 = vmul.f32 %v3208_v0, %v472_v44  ;;  %2352 = vmatpush3.bf16.msra.mxu1 %v2349_v55  ;;  %2295 = vmatprep.mubr.msk.f32.mxu0 %vm64_vm0, %v2649_v41  ;;  %v2662_v61 = vld [vmem:[%s4032_s0 + $0x88] sm:$0xff]  ;;  %v2665_v44 = vld [vmem:[%s4032_s0 + $0xa0] sm:$0xff]  ;;  %v2668_v24 = vld [vmem:[%s4032_s0 + $0xb8] sm:$0xff] }
 0x165   :  { %v416_v20 = vadd.f32 1e-05, %v384_v39  ;;  %v2438_v48 = vpop.eup %2437  ;;  %2183 = vmatprep.mubr.msk.f32.mxu1 %vm64_vm0, %v548_v34  ;;  %v353_v25 = vpop.xlane.xlu1 %352  ;;  %v549_v50 = vadd.f32 %v3214_v31, %v510_v42  ;;  %v473_v51 = vmul.f32 %v2436_v7, %v3129_v28  ;;  %2354 = vmatprep.subr.bf16.mxu1 %v2353_v23  ;;  %v2664_v39 = vld [vmem:[%s4032_s0 + $0x98] sm:$0xff]  ;;  %v2666_v34 = vld [vmem:[%s4032_s0 + $0xa8] sm:$0xff]  ;;  %v2667_v42 = vld [vmem:[%s4032_s0 + $0xb0] sm:$0xff] }
 0x166   :  { %2447 = vrsqrt.f32 %v415_v27  ;;  %v385_v13 = vmul.f32 0.03125, %v353_v25  ;;  %v550_v36 = vadd.f32 %v3214_v31, %v511_v46  ;;  %v474_v2 = vmul.f32 %v2438_v48, %v3138_v32  ;;  %v2669_v7 = vld [vmem:[%s4032_s0 + $0xc0] sm:$0xff]  ;;  %v2670_v27 = vld [vmem:[%s4032_s0 + $0xc8] sm:$0xff]  ;;  %v1058_v46 = vld [vmem:[%s4035_s5 + $0x30] sm:$0xff] }
 0x167   :  { %2449 = vrsqrt.f32 %v416_v20  ;;  %2184 = vmatmul.mubr.msk.f32.gmra.mrb[4].mxu1 %vm64_vm0, %v549_v50  ;;  %v512_v1 = vmul.f32 %v3208_v0, %v473_v51  ;;  %2296 = vmatmul.mubr.msk.f32.gmra.mrb[20].mxu0 %vm64_vm0, %v2650_v15  ;;  %v2671_v20 = vld [vmem:[%s4032_s0 + $0xd0] sm:$0xff]  ;;  %v1059_v41 = vld [vmem:[%s4035_s5 + $0x38] sm:$0xff]  ;;  %v2673_v50 = vld [vmem:[%s4032_s0 + $0xe0] sm:$0xff] }
 0x168   :  { %v2440_v10 = vpop.eup %2439  ;;  %v417_v28 = vadd.f32 1e-05, %v385_v13  ;;  %2186 = vmatprep.mubr.msk.f32.mxu1 %vm64_vm0, %v550_v36  ;;  %v513_v33 = vmul.f32 %v3208_v0, %v474_v2  ;;  %2356 = vmatpush3.bf16.msra.mxu1 %v2353_v23  ;;  %v2672_v48 = vld [vmem:[%s4032_s0 + $0xd8] sm:$0xff]  ;;  %v2357_v25 = vpack.c.bf16 %v1059_v41, %v1058_v46  ;;  %v1060_v51 = vld [vmem:[%s4035_s5 + $0x40] sm:$0xff]  ;;  %v1061_v13 = vld [vmem:[%s4035_s5 + $0x48] sm:$0xff] }
 0x169   :  { %v2442_v29 = vpop.eup %2441  ;;  %v551_v32 = vadd.f32 %v3214_v31, %v512_v1  ;;  %v475_v37 = vmul.f32 %v2440_v10, %v3141_v45  ;;  %2298 = vmatprep.mubr.msk.f32.mxu0 %vm64_vm0, %v2651_v54  ;;  %v2674_v36 = vld [vmem:[%s4032_s0 + $0xe8] sm:$0xff]  ;;  %v2361_v2 = vpack.c.bf16 %v1061_v13, %v1060_v51  ;;  %v2675_v1 = vld [vmem:[%s4032_s0 + $0xf0] sm:$0xff]  ;;  %v1063_v10 = vld [vmem:[%s4035_s5 + $0x58] sm:$0xff] }
 0x16a   :  { %2451 = vrsqrt.f32 %v417_v28  ;;  %v552_v8 = vadd.f32 %v3214_v31, %v513_v33  ;;  %v476_v35 = vmul.f32 %v2442_v29, %v3150_v47  ;;  %2358 = vmatprep.subr.bf16.mxu1 %v2357_v25  ;;  %v1062_v15 = vld [vmem:[%s4035_s5 + $0x50] sm:$0xff]  ;;  %v2676_v28 = vld [vmem:[%s4032_s0 + $0xf8] sm:$0xff]  ;;  %v1064_v29 = vld [vmem:[%s4035_s5 + $0x60] sm:$0xff] }
 0x16b   :  { %2187 = vmatmul.mubr.msk.f32.gmra.mrb[6].mxu1 %vm64_vm0, %v551_v32  ;;  %v514_v62 = vmul.f32 %v3208_v0, %v475_v37  ;;  %2299 = vmatmul.mubr.msk.f32.gmra.mrb[22].mxu0 %vm64_vm0, %v2652_v52  ;;  %v2365_v33 = vpack.c.bf16 %v1063_v10, %v1062_v15  ;;  %v1065_v32 = vld [vmem:[%s4035_s5 + $0x68] sm:$0xff]  ;;  %v1066_v54 = vld [vmem:[%s4035_s5 + $0x70] sm:$0xff] }
 0x16c   :  { %v2444_v45 = vpop.eup %2443  ;;  %2189 = vmatprep.mubr.msk.f32.mxu1 %vm64_vm0, %v552_v8  ;;  %v515_v5 = vmul.f32 %v3208_v0, %v476_v35  ;;  %2301 = vmatprep.mubr.msk.f32.mxu0 %vm64_vm0, %v2653_v3  ;;  %v2369_v37 = vpack.c.bf16 %v1065_v32, %v1064_v29  ;;  %v1067_v8 = vld [vmem:[%s4035_s5 + $0x78] sm:$0xff] }
 0x16d   :  { %v2446_v47 = vpop.eup %2445  ;;  %v553_v4 = vadd.f32 %v3214_v31, %v514_v62  ;;  %v477_v17 = vmul.f32 %v2444_v45, %v3153_v49  ;;  %v2655_v49 = vld [vmem:[%s4032_s0 + $0x50] sm:$0xff]  ;;  %2360 = vmatpush3.bf16.msra.mxu1 %v2357_v25  ;;  %v2373_v35 = vpack.c.bf16 %v1067_v8, %v1066_v54  ;;  %v3524_v62 = vld [vmem:[%s4038_s4] ss:$0 sm:$0xff] }
 0x16e   :  { %v554_v55 = vadd.f32 %v3214_v31, %v515_v5  ;;  %v478_v26 = vmul.f32 %v2446_v47, %v3162_v63  ;;  %2362 = vmatprep.subr.bf16.mxu1 %v2361_v2 }
 0x16f   :  { %2190 = vmatmul.mubr.msk.f32.gmra.mrb[8].mxu1 %vm64_vm0, %v553_v4  ;;  %v516_v6 = vmul.f32 %v3208_v0, %v477_v17  ;;  %2302 = vmatmul.mubr.msk.f32.gmra.mrb[24].mxu0 %vm64_vm0, %v2654_v12 }
 0x170   :  { %v2448_v14 = vpop.eup %2447  ;;  %2192 = vmatprep.mubr.msk.f32.mxu1 %vm64_vm0, %v554_v55  ;;  %v517_v11 = vmul.f32 %v3208_v0, %v478_v26  ;;  %2304 = vmatprep.mubr.msk.f32.mxu0 %vm64_vm0, %v2655_v49 }
 0x171   :  { %v2450_v63 = vpop.eup %2449  ;;  %v555_v43 = vadd.f32 %v3214_v31, %v516_v6  ;;  %v479_v38 = vmul.f32 %v2448_v14, %v3165_v53  ;;  %v2657_v53 = vld [vmem:[%s4032_s0 + $0x60] sm:$0xff]  ;;  %2364 = vmatpush3.bf16.msra.mxu1 %v2361_v2 }
 0x172   :  { %v556_v40 = vadd.f32 %v3214_v31, %v517_v11  ;;  %v480_v18 = vmul.f32 %v2450_v63, %v3174_v19  ;;  %2366 = vmatprep.subr.bf16.mxu1 %v2365_v33 }
 0x173   :  { %2193 = vmatmul.mubr.msk.f32.gmra.mrb[10].mxu1 %vm64_vm0, %v555_v43  ;;  %v518_v56 = vmul.f32 %v3208_v0, %v479_v38  ;;  %2305 = vmatmul.mubr.msk.f32.gmra.mrb[26].mxu0 %vm64_vm0, %v2656_v22 }
 0x174   :  { %v2452_v23 = vpop.eup %2451  ;;  %2195 = vmatprep.mubr.msk.f32.mxu1 %vm64_vm0, %v556_v40  ;;  %v519_v16 = vmul.f32 %v3208_v0, %v480_v18  ;;  %2307 = vmatprep.mubr.msk.f32.mxu0 %vm64_vm0, %v2657_v53 }
 0x175   :  { %v557_v19 = vadd.f32 %v3214_v31, %v518_v56  ;;  %v481_v21 = vmul.f32 %v2452_v23, %v3177_v57  ;;  %2368 = vmatpush3.bf16.msra.mxu1 %v2365_v33 }
 0x176   :  { %v558_v9 = vadd.f32 %v3214_v31, %v519_v16  ;;  %2370 = vmatprep.subr.bf16.mxu1 %v2369_v37 }
 0x177   :  { %2196 = vmatmul.mubr.msk.f32.gmra.mrb[12].mxu1 %vm64_vm0, %v557_v19  ;;  %v520_v30 = vmul.f32 %v3208_v0, %v481_v21  ;;  %2308 = vmatmul.mubr.msk.f32.gmra.mrb[28].mxu0 %vm64_vm0, %v2658_v58  ;;  %v2660_v0 = vld [vmem:[%s4032_s0 + $0x78] sm:$0xff] }
 0x178   :  { %2198 = vmatprep.mubr.msk.f32.mxu1 %vm64_vm0, %v558_v9  ;;  %2310 = vmatprep.mubr.msk.f32.mxu0 %vm64_vm0, %v2659_v59 }
 0x179   :  { %v559_v57 = vadd.f32 %v3214_v31, %v520_v30  ;;  %v2663_v31 = vld [vmem:[%s4032_s0 + $0x90] sm:$0xff]  ;;  %2372 = vmatpush3.bf16.msra.mxu1 %v2369_v37 }
 0x17a   :  { %2374 = vmatprep.subr.bf16.mxu1 %v2373_v35 }
 0x17b   :  { %2199 = vmatmul.mubr.msk.f32.gmra.mrb[14].mxu1 %vm64_vm0, %v559_v57  ;;  %2311 = vmatmul.mubr.msk.f32.gmra.mrb[30].mxu0 %vm64_vm0, %v2660_v0 }
 0x17c   :  { %2313 = vmatprep.mubr.msk.f32.mxu0 %vm64_vm0, %v2661_v60 }
 0x17d   :  { %2376 = vmatpush3.bf16.msra.mxu1 %v2373_v35 }
 0x17f   :  { %2314 = vmatmul.mubr.msk.f32.gmra.mrb[32].mxu0 %vm64_vm0, %v2662_v61 }
 0x180   :  { %2316 = vmatprep.mubr.msk.f32.mxu0 %vm64_vm0, %v2663_v31 }
 0x183   :  { %2317 = vmatmul.mubr.msk.f32.gmra.mrb[34].mxu0 %vm64_vm0, %v2664_v39 }
 0x184   :  { %2319 = vmatprep.mubr.msk.f32.mxu0 %vm64_vm0, %v2665_v44 }
 0x187   :  { %2320 = vmatmul.mubr.msk.f32.gmra.mrb[36].mxu0 %vm64_vm0, %v2666_v34 }
 0x188   :  { %2322 = vmatprep.mubr.msk.f32.mxu0 %vm64_vm0, %v2667_v42 }
 0x18b   :  { %2323 = vmatmul.mubr.msk.f32.gmra.mrb[38].mxu0 %vm64_vm0, %v2668_v24 }
 0x18c   :  { %2325 = vmatprep.mubr.msk.f32.mxu0 %vm64_vm0, %v2669_v7 }
 0x18f   :  { %2326 = vmatmul.mubr.msk.f32.gmra.mrb[40].mxu0 %vm64_vm0, %v2670_v27 }
 0x190   :  { %2328 = vmatprep.mubr.msk.f32.mxu0 %vm64_vm0, %v2671_v20 }
 0x193   :  { %2329 = vmatmul.mubr.msk.f32.gmra.mrb[42].mxu0 %vm64_vm0, %v2672_v48 }
 0x194   :  { %2331 = vmatprep.mubr.msk.f32.mxu0 %vm64_vm0, %v2673_v50 }
 0x197   :  { %2332 = vmatmul.mubr.msk.f32.gmra.mrb[44].mxu0 %vm64_vm0, %v2674_v36 }
 0x198   :  { %2334 = vmatprep.mubr.msk.f32.mxu0 %vm64_vm0, %v2675_v1 }
 0x19b   :  { %2335 = vmatmul.mubr.msk.f32.gmra.mrb[46].mxu0 %vm64_vm0, %v2676_v28 }
 0x212   :  { %v2155_v52 = vpop.f32.mrb[0].mxu0 }
 0x213   :  { %v739_v45 = vadd.f32 %v2155_v52, %v3524_v62  ;;  %v733_v5 = vpop.f32.mrb[1].mxu0 }
 0x214   :  { %v734_v3 = vadd.f32 %v3524_v62, %v733_v5 }
 0x215   :  { %v925_v47 = vmul.f32 0.70710677, %v739_v45  ;;  %v893_v60 = vmul.f32 0.5, %v739_v45 }
 0x216   :  { %v924_v4 = vmul.f32 0.70710677, %v734_v3  ;;  %v2158_v17 = vpop.f32.mrb[2].mxu0  ;;  %v892_v58 = vmul.f32 0.5, %v734_v3 }
 0x217   :  { %2453 = verf.f32 %v925_v47  ;;  %v749_v55 = vadd.f32 %v2158_v17, %v3524_v62  ;;  %v743_v26 = vpop.f32.mrb[3].mxu0 }
 0x218   :  { %2455 = verf.f32 %v924_v4  ;;  %v744_v6 = vadd.f32 %v3524_v62, %v743_v26 }
 0x219   :  { %v927_v12 = vmul.f32 0.70710677, %v749_v55  ;;  %v895_v25 = vmul.f32 0.5, %v749_v55 }
 0x21a   :  { %v926_v14 = vmul.f32 0.70710677, %v744_v6  ;;  %v2161_v11 = vpop.f32.mrb[4].mxu0  ;;  %v894_v20 = vmul.f32 0.5, %v744_v6 }
 0x21b   :  { %2457 = verf.f32 %v927_v12  ;;  %v759_v49 = vadd.f32 %v2161_v11, %v3524_v62  ;;  %v753_v63 = vpop.f32.mrb[5].mxu0 }
 0x21c   :  { %2459 = verf.f32 %v926_v14  ;;  %v754_v43 = vadd.f32 %v3524_v62, %v753_v63 }
 0x21d   :  { %v929_v38 = vmul.f32 0.70710677, %v759_v49  ;;  %v897_v54 = vmul.f32 0.5, %v759_v49 }
 0x21e   :  { %v928_v40 = vmul.f32 0.70710677, %v754_v43  ;;  %v2164_v18 = vpop.f32.mrb[6].mxu0  ;;  %v896_v33 = vmul.f32 0.5, %v754_v43 }
 0x21f   :  { %2461 = verf.f32 %v929_v38  ;;  %v3533_v56 = vadd.f32 %v2164_v18, %v3524_v62  ;;  %v763_v22 = vpop.f32.mrb[7].mxu0 }
 0x220   :  { %2463 = verf.f32 %v928_v40  ;;  %v764_v23 = vadd.f32 %v3524_v62, %v763_v22 }
 0x221   :  { %v2454_v16 = vpop.eup %2453  ;;  %v931_v53 = vmul.f32 0.70710677, %v3533_v56  ;;  %v899_v14 = vmul.f32 0.5, %v3533_v56 }
 0x222   :  { %v2456_v19 = vpop.eup %2455  ;;  %v989_v21 = vadd.f32 1.0, %v2454_v16  ;;  %v930_v9 = vmul.f32 0.70710677, %v764_v23  ;;  %v2167_v30 = vpop.f32.mrb[8].mxu0  ;;  %v898_v55 = vmul.f32 0.5, %v764_v23 }
 0x223   :  { %v988_v59 = vadd.f32 1.0, %v2456_v19  ;;  %2465 = verf.f32 %v931_v53  ;;  %v3538_v57 = vadd.f32 %v2167_v30, %v3524_v62  ;;  %v773_v0 = vpop.f32.mrb[9].mxu0 }
 0x224   :  { %2467 = verf.f32 %v930_v9  ;;  %v3541_v61 = vadd.f32 %v3524_v62, %v773_v0  ;;  %v1021_v42 = vmul.f32 %v989_v21, %v893_v60 }
 0x225   :  { %v2458_v31 = vpop.eup %2457  ;;  %v933_v39 = vmul.f32 0.70710677, %v3538_v57  ;;  %v1020_v44 = vmul.f32 %v988_v59, %v892_v58  ;;  %v901_v30 = vmul.f32 0.5, %v3538_v57 }
 0x226   :  { %v2460_v34 = vpop.eup %2459  ;;  %v991_v24 = vadd.f32 1.0, %v2458_v31  ;;  %v932_v7 = vmul.f32 0.70710677, %v3541_v61  ;;  %v2170_v27 = vpop.f32.mrb[10].mxu0  ;;  %v900_v53 = vmul.f32 0.5, %v3541_v61 }
 0x227   :  { %v990_v46 = vadd.f32 1.0, %v2460_v34  ;;  %2469 = verf.f32 %v933_v39  ;;  %v3546_v41 = vadd.f32 %v2170_v27, %v3524_v62  ;;  %v783_v48 = vpop.f32.mrb[11].mxu0  ;;  %2233 = vmatprep.mubr.f32.mxu1 %v1020_v44 }
 0x228   :  { %2471 = verf.f32 %v932_v7  ;;  %v3549_v50 = vadd.f32 %v3524_v62, %v783_v48  ;;  %2234 = vmatmul.mubr.f32.vlgmr.msra.gmra.mrb[16].mxu1 %v1021_v42  ;;  %v1023_v28 = vmul.f32 %v991_v24, %v895_v25 }
 0x229   :  { %v2462_v51 = vpop.eup %2461  ;;  %v935_v13 = vmul.f32 0.70710677, %v3546_v41  ;;  %v1022_v36 = vmul.f32 %v990_v46, %v894_v20  ;;  %v903_v46 = vmul.f32 0.5, %v3546_v41 }
 0x22a   :  { %v2464_v2 = vpop.eup %2463  ;;  %v993_v1 = vadd.f32 1.0, %v2462_v51  ;;  %v934_v15 = vmul.f32 0.70710677, %v3549_v50  ;;  %v2173_v10 = vpop.f32.mrb[12].mxu0  ;;  %v902_v24 = vmul.f32 0.5, %v3549_v50 }
 0x22b   :  { %v992_v29 = vadd.f32 1.0, %v2464_v2  ;;  %2473 = verf.f32 %v935_v13  ;;  %v3554_v32 = vadd.f32 %v2173_v10, %v3524_v62  ;;  %v793_v37 = vpop.f32.mrb[13].mxu0  ;;  %2236 = vmatprep.mubr.f32.mxu1 %v1022_v36 }
 0x22c   :  { %2475 = verf.f32 %v934_v15  ;;  %v3557_v8 = vadd.f32 %v3524_v62, %v793_v37  ;;  %2237 = vmatmul.mubr.f32.gmra.mrb[18].mxu1 %v1023_v28  ;;  %v1025_v17 = vmul.f32 %v993_v1, %v897_v54 }
 0x22d   :  { %v2466_v35 = vpop.eup %2465  ;;  %v937_v52 = vmul.f32 0.70710677, %v3554_v32  ;;  %v1024_v45 = vmul.f32 %v992_v29, %v896_v33  ;;  %v905_v54 = vmul.f32 0.5, %v3554_v32 }
 0x22e   :  { %v2468_v5 = vpop.eup %2467  ;;  %v995_v3 = vadd.f32 1.0, %v2466_v35  ;;  %v936_v47 = vmul.f32 0.70710677, %v3557_v8  ;;  %v2176_v4 = vpop.f32.mrb[14].mxu0  ;;  %v904_v28 = vmul.f32 0.5, %v3557_v8 }
 0x22f   :  { %v994_v26 = vadd.f32 1.0, %v2468_v5  ;;  %2477 = verf.f32 %v937_v52  ;;  %v3562_v6 = vadd.f32 %v2176_v4, %v3524_v62  ;;  %v803_v12 = vpop.f32.mrb[15].mxu0  ;;  %2239 = vmatprep.mubr.f32.mxu1 %v1024_v45 }
 0x230   :  { %2479 = verf.f32 %v936_v47  ;;  %v3566_v11 = vadd.f32 %v3524_v62, %v803_v12  ;;  %2240 = vmatmul.mubr.f32.gmra.mrb[20].mxu1 %v1025_v17  ;;  %v1027_v23 = vmul.f32 %v995_v3, %v899_v14 }
 0x231   :  { %v2470_v49 = vpop.eup %2469  ;;  %v939_v63 = vmul.f32 0.70710677, %v3562_v6  ;;  %v1026_v43 = vmul.f32 %v994_v26, %v898_v55 }
 0x232   :  { %v2472_v38 = vpop.eup %2471  ;;  %v997_v40 = vadd.f32 1.0, %v2470_v49  ;;  %v938_v18 = vmul.f32 0.70710677, %v3566_v11  ;;  %v2179_v22 = vpop.f32.mrb[0].mxu1  ;;  %v906_v26 = vmul.f32 0.5, %v3566_v11 }
 0x233   :  { %v3570_v16 = vpop.f32.mrb[16].mxu0  ;;  %v996_v56 = vadd.f32 1.0, %v2472_v38  ;;  %2481 = verf.f32 %v939_v63  ;;  %v3574_v19 = vadd.f32 %v2179_v22, %v3524_v62  ;;  %v813_v21 = vpop.f32.mrb[1].mxu1  ;;  %2242 = vmatprep.mubr.f32.mxu1 %v1026_v43  ;;  %v907_v63 = vmul.f32 0.5, %v3562_v6 }
 0x234   :  { %v3576_v9 = vpop.f32.mrb[17].mxu0  ;;  %2483 = verf.f32 %v938_v18  ;;  %v3580_v58 = vadd.f32 %v3524_v62, %v813_v21  ;;  %2243 = vmatmul.mubr.f32.gmra.mrb[22].mxu1 %v1027_v23  ;;  %v1029_v34 = vmul.f32 %v997_v40, %v901_v30 }
 0x235   :  { %v2474_v59 = vpop.eup %2473  ;;  %v941_v0 = vmul.f32 0.70710677, %v3574_v19  ;;  %v1028_v60 = vmul.f32 %v996_v56, %v900_v53 }
 0x236   :  { %v2476_v61 = vpop.eup %2475  ;;  %v999_v31 = vadd.f32 1.0, %v2474_v59  ;;  %v940_v39 = vmul.f32 0.70710677, %v3580_v58  ;;  %v2182_v44 = vpop.f32.mrb[2].mxu1  ;;  %v908_v30 = vmul.f32 0.5, %v3580_v58 }
 0x237   :  { %v3584_v42 = vpop.f32.mrb[18].mxu0  ;;  %v998_v57 = vadd.f32 1.0, %v2476_v61  ;;  %2485 = verf.f32 %v941_v0  ;;  %v3588_v7 = vadd.f32 %v2182_v44, %v3524_v62  ;;  %v823_v27 = vpop.f32.mrb[3].mxu1  ;;  %2245 = vmatprep.mubr.f32.mxu1 %v1028_v60  ;;  %v909_v61 = vmul.f32 0.5, %v3574_v19 }
 0x238   :  { %v3590_v20 = vpop.f32.mrb[19].mxu0  ;;  %2487 = verf.f32 %v940_v39  ;;  %v3594_v48 = vadd.f32 %v3524_v62, %v823_v27  ;;  %2246 = vmatmul.mubr.f32.gmra.mrb[24].mxu1 %v1029_v34  ;;  %v1031_v15 = vmul.f32 %v999_v31, %v903_v46 }
 0x239   :  { %v2478_v25 = vpop.eup %2477  ;;  %v943_v51 = vmul.f32 0.70710677, %v3588_v7  ;;  %v1030_v50 = vmul.f32 %v998_v57, %v902_v24 }
 0x23a   :  { %v2480_v13 = vpop.eup %2479  ;;  %v1001_v36 = vadd.f32 1.0, %v2478_v25  ;;  %v942_v2 = vmul.f32 0.70710677, %v3594_v48  ;;  %v2185_v1 = vpop.f32.mrb[4].mxu1 }
 0x23b   :  { %v3598_v10 = vpop.f32.mrb[20].mxu0  ;;  %v1000_v41 = vadd.f32 1.0, %v2480_v13  ;;  %2489 = verf.f32 %v943_v51  ;;  %v3602_v33 = vadd.f32 %v2185_v1, %v3524_v62  ;;  %v833_v29 = vpop.f32.mrb[5].mxu1  ;;  %2248 = vmatprep.mubr.f32.mxu1 %v1030_v50  ;;  %v910_v51 = vmul.f32 0.5, %v3594_v48 }
 0x23c   :  { %v3604_v37 = vpop.f32.mrb[21].mxu0  ;;  %2491 = verf.f32 %v942_v2  ;;  %v3608_v35 = vadd.f32 %v3524_v62, %v833_v29  ;;  %2249 = vmatmul.mubr.f32.gmra.mrb[26].mxu1 %v1031_v15  ;;  %v1033_v17 = vmul.f32 %v1001_v36, %v905_v54  ;;  %v911_v2 = vmul.f32 0.5, %v3588_v7 }
 0x23d   :  { %v2482_v52 = vpop.eup %2481  ;;  %v945_v45 = vmul.f32 0.70710677, %v3602_v33  ;;  %v1032_v8 = vmul.f32 %v1000_v41, %v904_v28 }
 0x23e   :  { %v2484_v5 = vpop.eup %2483  ;;  %v1003_v3 = vadd.f32 1.0, %v2482_v52  ;;  %v944_v47 = vmul.f32 0.70710677, %v3608_v35  ;;  %v2188_v4 = vpop.f32.mrb[6].mxu1 }
 0x23f   :  { %v3612_v55 = vpop.f32.mrb[22].mxu0  ;;  %v1002_v32 = vadd.f32 1.0, %v2484_v5  ;;  %2493 = verf.f32 %v945_v45  ;;  %v3616_v12 = vadd.f32 %v2188_v4, %v3524_v62  ;;  %v843_v14 = vpop.f32.mrb[7].mxu1  ;;  %2251 = vmatprep.mubr.f32.mxu1 %v1032_v8  ;;  %v912_v5 = vmul.f32 0.5, %v3608_v35 }
 0x240   :  { %v3618_v49 = vpop.f32.mrb[23].mxu0  ;;  %2495 = verf.f32 %v944_v47  ;;  %v3622_v43 = vadd.f32 %v3524_v62, %v843_v14  ;;  %2252 = vmatmul.mubr.f32.gmra.mrb[28].mxu1 %v1033_v17  ;;  %v1035_v56 = vmul.f32 %v1003_v3, %v907_v63  ;;  %v913_v17 = vmul.f32 0.5, %v3602_v33 }
 0x241   :  { %v2486_v38 = vpop.eup %2485  ;;  %v947_v40 = vmul.f32 0.70710677, %v3616_v12  ;;  %v1034_v11 = vmul.f32 %v1002_v32, %v906_v26  ;;  %v915_v33 = vmul.f32 0.5, %v3616_v12 }
 0x242   :  { %v2488_v18 = vpop.eup %2487  ;;  %v1005_v22 = vadd.f32 1.0, %v2486_v38  ;;  %v946_v23 = vmul.f32 0.70710677, %v3622_v43  ;;  %v2191_v53 = vpop.f32.mrb[8].mxu1 }
 0x243   :  { %v3626_v21 = vpop.f32.mrb[24].mxu0  ;;  %v1004_v6 = vadd.f32 1.0, %v2488_v18  ;;  %2497 = verf.f32 %v947_v40  ;;  %v3630_v59 = vadd.f32 %v2191_v53, %v3524_v62  ;;  %v853_v0 = vpop.f32.mrb[9].mxu1  ;;  %2254 = vmatprep.mubr.f32.mxu1 %v1034_v11 }
 0x244   :  { %v3632_v60 = vpop.f32.mrb[25].mxu0  ;;  %2499 = verf.f32 %v946_v23  ;;  %v3636_v31 = vadd.f32 %v3524_v62, %v853_v0  ;;  %2255 = vmatmul.mubr.f32.gmra.mrb[30].mxu1 %v1035_v56  ;;  %v1037_v46 = vmul.f32 %v1005_v22, %v909_v61  ;;  %v914_v22 = vmul.f32 0.5, %v3622_v43 }
 0x245   :  { %v2490_v39 = vpop.eup %2489  ;;  %v949_v44 = vmul.f32 0.70710677, %v3630_v59  ;;  %v1036_v58 = vmul.f32 %v1004_v6, %v908_v30 }
 0x246   :  { %v2492_v34 = vpop.eup %2491  ;;  %v1007_v24 = vadd.f32 1.0, %v2490_v39  ;;  %v948_v57 = vmul.f32 0.70710677, %v3636_v31  ;;  %v2194_v27 = vpop.f32.mrb[10].mxu1  ;;  %v916_v43 = vmul.f32 0.5, %v3636_v31 }
 0x247   :  { %v3640_v25 = vpop.f32.mrb[26].mxu0  ;;  %v1006_v19 = vadd.f32 1.0, %v2492_v34  ;;  %2501 = verf.f32 %v949_v44  ;;  %v3644_v50 = vadd.f32 %v2194_v27, %v3524_v62  ;;  %v863_v13 = vpop.f32.mrb[11].mxu1  ;;  %2257 = vmatprep.mubr.f32.mxu1 %v1036_v58 }
 0x248   :  { %v3646_v36 = vpop.f32.mrb[27].mxu0  ;;  %2503 = verf.f32 %v948_v57  ;;  %v864_v1 = vadd.f32 %v3524_v62, %v863_v13  ;;  %2258 = vmatmul.mubr.f32.gmra.mrb[32].mxu1 %v1037_v46  ;;  %v1039_v45 = vmul.f32 %v1007_v24, %v911_v2  ;;  %v917_v57 = vmul.f32 0.5, %v3630_v59 }
 0x249   :  { %v2494_v15 = vpop.eup %2493  ;;  %v951_v28 = vmul.f32 0.70710677, %v3644_v50  ;;  %v1038_v41 = vmul.f32 %v1006_v19, %v910_v51  ;;  %v919_v2 = vmul.f32 0.5, %v3644_v50 }
 0x24a   :  { %v2496_v48 = vpop.eup %2495  ;;  %v1009_v29 = vadd.f32 1.0, %v2494_v15  ;;  %v950_v54 = vmul.f32 0.70710677, %v864_v1  ;;  %v2197_v52 = vpop.f32.mrb[12].mxu1  ;;  %v918_v19 = vmul.f32 0.5, %v864_v1 }
 0x24b   :  { %v3651_v8 = vpop.f32.mrb[28].mxu0  ;;  %v1008_v3 = vadd.f32 1.0, %v2496_v48  ;;  %2505 = verf.f32 %v951_v28  ;;  %v879_v7 = vadd.f32 %v2197_v52, %v3524_v62  ;;  %v873_v47 = vpop.f32.mrb[13].mxu1  ;;  %2260 = vmatprep.mubr.f32.mxu1 %v1038_v41 }
 0x24c   :  { %v3655_v4 = vpop.f32.mrb[29].mxu0  ;;  %2507 = verf.f32 %v950_v54  ;;  %v874_v26 = vadd.f32 %v3524_v62, %v873_v47  ;;  %2261 = vmatmul.mubr.f32.gmra.mrb[34].mxu1 %v1039_v45  ;;  %v1041_v18 = vmul.f32 %v1009_v29, %v913_v17 }
 0x24d   :  { %v2498_v32 = vpop.eup %2497  ;;  %v953_v14 = vmul.f32 0.70710677, %v879_v7  ;;  %v1040_v63 = vmul.f32 %v1008_v3, %v912_v5  ;;  %v921_v54 = vmul.f32 0.5, %v879_v7 }
 0x24e   :  { %v2500_v38 = vpop.eup %2499  ;;  %v1011_v40 = vadd.f32 1.0, %v2498_v32  ;;  %v952_v35 = vmul.f32 0.70710677, %v874_v26  ;;  %v2200_v11 = vpop.f32.mrb[14].mxu1  ;;  %v920_v29 = vmul.f32 0.5, %v874_v26 }
 0x24f   :  { %v1010_v23 = vadd.f32 1.0, %v2500_v38  ;;  %2509 = verf.f32 %v953_v14  ;;  %v889_v53 = vadd.f32 %v2200_v11, %v3524_v62  ;;  %v883_v56 = vpop.f32.mrb[15].mxu1  ;;  %2263 = vmatprep.mubr.f32.mxu1 %v1040_v63  ;;  %v3666_v63 = vpop.f32.mrb[30].mxu0 }
 0x250   :  { %2511 = verf.f32 %v952_v35  ;;  %v884_v30 = vadd.f32 %v3524_v62, %v883_v56  ;;  %2264 = vmatmul.mubr.f32.gmra.mrb[36].mxu1 %v1041_v18  ;;  %v1043_v34 = vmul.f32 %v1011_v40, %v915_v33  ;;  %v3668_v26 = vpop.f32.mrb[31].mxu0 }
 0x251   :  { %v2502_v6 = vpop.eup %2501  ;;  %v955_v0 = vmul.f32 0.70710677, %v889_v53  ;;  %v1042_v61 = vmul.f32 %v1010_v23, %v914_v22  ;;  %v923_v50 = vmul.f32 0.5, %v889_v53 }
 0x252   :  { %v2504_v39 = vpop.eup %2503  ;;  %v1013_v44 = vadd.f32 1.0, %v2502_v6  ;;  %v954_v58 = vmul.f32 0.70710677, %v884_v30  ;;  %v922_v47 = vmul.f32 0.5, %v884_v30  ;;  %v3670_v7 = vpop.f32.mrb[32].mxu0 }
 0x253   :  { %v1012_v24 = vadd.f32 1.0, %v2504_v39  ;;  %2513 = verf.f32 %v955_v0  ;;  %2266 = vmatprep.mubr.f32.mxu1 %v1042_v61  ;;  %v3672_v38 = vpop.f32.mrb[33].mxu0 }
 0x254   :  { %2515 = verf.f32 %v954_v58  ;;  %2267 = vmatmul.mubr.f32.gmra.mrb[38].mxu1 %v1043_v34  ;;  %v1045_v51 = vmul.f32 %v1013_v44, %v917_v57  ;;  %v3705_v44 = vld [vmem:[%s4039_s8] ss:$0 sm:$0xff] }
 0x255   :  { %v2506_v12 = vpop.eup %2505  ;;  %v1044_v27 = vmul.f32 %v1012_v24, %v916_v43  ;;  %v1479_v58 = vadd.f32 %v3570_v16, %v3705_v44  ;;  %v1474_v34 = vadd.f32 %v3705_v44, %v3576_v9  ;;  %v1489_v24 = vadd.f32 %v3584_v42, %v3705_v44 }
 0x256   :  { %v2508_v62 = vpop.eup %2507  ;;  %v1015_v46 = vadd.f32 1.0, %v2506_v12  ;;  %v3674_v40 = vpop.f32.mrb[34].mxu0  ;;  %v1494_v16 = vadd.f32 %v3705_v44, %v3604_v37  ;;  %v1509_v9 = vadd.f32 %v3612_v55, %v3705_v44  ;;  %v1504_v42 = vadd.f32 %v3705_v44, %v3618_v49 }
 0x257   :  { %v1014_v13 = vadd.f32 1.0, %v2508_v62  ;;  %2269 = vmatprep.mubr.f32.mxu1 %v1044_v27  ;;  %v3676_v35 = vpop.f32.mrb[35].mxu0  ;;  %v1994_v43 = vmul.f32 -1.442695, %v1479_v58  ;;  %v1993_v57 = vmul.f32 -1.442695, %v1474_v34  ;;  %v1484_v27 = vadd.f32 %v3705_v44, %v3590_v20 }
 0x258   :  { %2270 = vmatmul.mubr.f32.gmra.mrb[40].mxu1 %v1045_v51  ;;  %v1047_v48 = vmul.f32 %v1015_v46, %v919_v2  ;;  %v1996_v12 = vmul.f32 -1.442695, %v1489_v24  ;;  %v1499_v62 = vadd.f32 %v3598_v10, %v3705_v44  ;;  %v1519_v20 = vadd.f32 %v3626_v21, %v3705_v44 }
 0x259   :  { %v2510_v15 = vpop.eup %2509  ;;  %v1046_v31 = vmul.f32 %v1014_v13, %v918_v19  ;;  %2517 = vpow2.f32 %v1994_v43  ;;  %v1995_v46 = vmul.f32 -1.442695, %v1484_v27  ;;  %v1997_v19 = vmul.f32 -1.442695, %v1494_v16 }
 0x25a   :  { %v2512_v28 = vpop.eup %2511  ;;  %v1017_v41 = vadd.f32 1.0, %v2510_v15  ;;  %v3678_v11 = vpop.f32.mrb[36].mxu0  ;;  %2519 = vpow2.f32 %v1993_v57  ;;  %v1998_v51 = vmul.f32 -1.442695, %v1499_v62  ;;  %v2000_v13 = vmul.f32 -1.442695, %v1509_v9 }
 0x25b   :  { %v1016_v59 = vadd.f32 1.0, %v2512_v28  ;;  %2272 = vmatprep.mubr.f32.mxu1 %v1046_v31  ;;  %v3680_v18 = vpop.f32.mrb[37].mxu0  ;;  %2521 = vpow2.f32 %v1996_v12  ;;  %v1999_v10 = vmul.f32 -1.442695, %v1504_v42  ;;  %v1514_v37 = vadd.f32 %v3705_v44, %v3632_v60  ;;  %v3748_v9 = vld [vmem:[%s4040_s6] ss:$0 sm:$0xff] }
 0x25c   :  { %2273 = vmatmul.mubr.f32.gmra.mrb[42].mxu1 %v1047_v48  ;;  %v1049_v1 = vmul.f32 %v1017_v41, %v921_v54  ;;  %2523 = vpow2.f32 %v1995_v46  ;;  %v2002_v55 = vmul.f32 -1.442695, %v1519_v20  ;;  %v1529_v31 = vadd.f32 %v3640_v25, %v3705_v44 }
 0x25d   :  { %v2514_v52 = vpop.eup %2513  ;;  %v1048_v45 = vmul.f32 %v1016_v59, %v920_v29  ;;  %2525 = vpow2.f32 %v1998_v51  ;;  %v2001_v41 = vmul.f32 -1.442695, %v1514_v37  ;;  %v1524_v21 = vadd.f32 %v3705_v44, %v3646_v36 }
 0x25e   :  { %v2516_v5 = vpop.eup %2515  ;;  %v1019_v3 = vadd.f32 1.0, %v2514_v52  ;;  %v3682_v22 = vpop.f32.mrb[38].mxu0  ;;  %2527 = vpow2.f32 %v1997_v19  ;;  %v1539_v29 = vadd.f32 %v3651_v8, %v3705_v44  ;;  %v2004_v60 = vmul.f32 -1.442695, %v1529_v31 }
 0x25f   :  { %v1018_v17 = vadd.f32 1.0, %v2516_v5  ;;  %2275 = vmatprep.mubr.f32.mxu1 %v1048_v45  ;;  %v3684_v23 = vpop.f32.mrb[39].mxu0  ;;  %2529 = vpow2.f32 %v2000_v13  ;;  %v1534_v59 = vadd.f32 %v3705_v44, %v3655_v4  ;;  %v2003_v25 = vmul.f32 -1.442695, %v1524_v21 }
 0x260   :  { %2276 = vmatmul.mubr.f32.gmra.mrb[44].mxu1 %v1049_v1  ;;  %v1051_v14 = vmul.f32 %v1019_v3, %v923_v50  ;;  %2531 = vpow2.f32 %v1999_v10  ;;  %v2006_v5 = vmul.f32 -1.442695, %v1539_v29  ;;  %v1549_v36 = vadd.f32 %v3666_v63, %v3705_v44 }
 0x261   :  { %v1050_v32 = vmul.f32 %v1018_v17, %v922_v47  ;;  %2533 = vpow2.f32 %v2002_v55  ;;  %v2005_v3 = vmul.f32 -1.442695, %v1534_v59  ;;  %v1559_v58 = vadd.f32 %v3670_v7, %v3705_v44 }
 0x262   :  { %v3686_v53 = vpop.f32.mrb[40].mxu0  ;;  %v2008_v50 = vmul.f32 -1.442695, %v1549_v36  ;;  %v1554_v24 = vadd.f32 %v3705_v44, %v3672_v38  ;;  %v1564_v31 = vadd.f32 %v3705_v44, %v3676_v35  ;;  %v1579_v21 = vadd.f32 %v3678_v11, %v3705_v44  ;;  %v2678_v11 = vld [vmem:[%s4032_s0] sm:$0xff] }
 0x263   :  { %2278 = vmatprep.mubr.f32.mxu1 %v1050_v32  ;;  %v3688_v56 = vpop.f32.mrb[41].mxu0  ;;  %v2518_v2 = vpop.eup %2517  ;;  %v1544_v32 = vadd.f32 %v3705_v44, %v3668_v26  ;;  %v2010_v62 = vmul.f32 -1.442695, %v1559_v58  ;;  %v1569_v26 = vadd.f32 %v3674_v40, %v3705_v44 }
 0x264   :  { %2279 = vmatmul.mubr.f32.gmra.mrb[46].mxu1 %v1051_v14  ;;  %v2520_v15 = vpop.eup %2519  ;;  %v1729_v49 = vadd.f32 1.0, %v2518_v2  ;;  %v2009_v38 = vmul.f32 -1.442695, %v1554_v24 }
 0x265   :  { %v2522_v28 = vpop.eup %2521  ;;  %v1728_v48 = vadd.f32 1.0, %v2520_v15  ;;  %v2007_v12 = vmul.f32 -1.442695, %v1544_v32  ;;  %v2012_v20 = vmul.f32 -1.442695, %v1569_v26  ;;  %v1589_v32 = vadd.f32 %v3682_v22, %v3705_v44 }
 0x266   :  { %v3690_v33 = vpop.f32.mrb[42].mxu0  ;;  %2535 = vrcp.f32 %v1729_v49  ;;  %v1731_v54 = vadd.f32 1.0, %v2522_v28  ;;  %v2524_v52 = vpop.eup %2523 }
 0x267   :  { %v3692_v30 = vpop.f32.mrb[43].mxu0  ;;  %2537 = vpow2.f32 %v2001_v41  ;;  %v2526_v45 = vpop.eup %2525  ;;  %v1730_v8 = vadd.f32 1.0, %v2524_v52 }
 0x268   :  { %2539 = vrcp.f32 %v1728_v48  ;;  %v2528_v1 = vpop.eup %2527  ;;  %v1733_v17 = vadd.f32 1.0, %v2526_v45 }
 0x269   :  { %2541 = vpow2.f32 %v2004_v60  ;;  %v2530_v47 = vpop.eup %2529  ;;  %v1732_v14 = vadd.f32 1.0, %v2528_v1 }
 0x26a   :  { %v3694_v6 = vpop.f32.mrb[44].mxu0  ;;  %2543 = vrcp.f32 %v1731_v54  ;;  %v2532_v4 = vpop.eup %2531  ;;  %v1735_v63 = vadd.f32 1.0, %v2530_v47  ;;  %v1574_v47 = vadd.f32 %v3705_v44, %v3680_v18 }
 0x26b   :  { %v3696_v0 = vpop.f32.mrb[45].mxu0  ;;  %2545 = vpow2.f32 %v2003_v25  ;;  %v2534_v34 = vpop.eup %2533  ;;  %v1734_v43 = vadd.f32 1.0, %v2532_v4  ;;  %v2677_v25 = vld [vmem:[%s4032_s0 + $0x8] sm:$0xff] }
 0x26c   :  { %2547 = vpow2.f32 %v2006_v5  ;;  %v1737_v7 = vadd.f32 1.0, %v2534_v34 }
 0x26d   :  { %2549 = vpow2.f32 %v2005_v3 }
 0x26e   :  { %v3698_v61 = vpop.f32.mrb[46].mxu0  ;;  %2551 = vrcp.f32 %v1730_v8  ;;  %v2011_v8 = vmul.f32 -1.442695, %v1564_v31 }
 0x26f   :  { %v3700_v39 = vpop.f32.mrb[47].mxu0  ;;  %2553 = vrcp.f32 %v1733_v17 }
 0x270   :  { %v2536_v57 = vpop.eup %2535  ;;  %2555 = vpow2.f32 %v2008_v50  ;;  %v2014_v50 = vmul.f32 -1.442695, %v1579_v21 }
 0x271   :  { %v2538_v27 = vpop.eup %2537  ;;  %2557 = vrcp.f32 %v1732_v14 }
 0x272   :  { %v2540_v16 = vpop.eup %2539  ;;  %2559 = vrcp.f32 %v1735_v63  ;;  %v1736_v42 = vadd.f32 1.0, %v2538_v27 }
 0x273   :  { %v2542_v46 = vpop.eup %2541  ;;  %2561 = vrcp.f32 %v1734_v43  ;;  %v2679_v43 = vld [vmem:[%s4032_s0 + $0x18] sm:$0xff] }
 0x274   :  { %v2544_v51 = vpop.eup %2543  ;;  %2563 = vpow2.f32 %v2007_v12  ;;  %v1739_v40 = vadd.f32 1.0, %v2542_v46  ;;  %v1584_v12 = vadd.f32 %v3705_v44, %v3684_v23 }
 0x275   :  { %v2546_v19 = vpop.eup %2545  ;;  %2565 = vpow2.f32 %v2010_v62  ;;  %v2680_v62 = vld [vmem:[%s4032_s0 + $0x10] sm:$0xff] }
 0x276   :  { %v2548_v10 = vpop.eup %2547  ;;  %2567 = vrcp.f32 %v1737_v7  ;;  %v1738_v28 = vadd.f32 1.0, %v2546_v19  ;;  %v2013_v7 = vmul.f32 -1.442695, %v1574_v47  ;;  %v2015_v31 = vmul.f32 -1.442695, %v1584_v12 }
 0x277   :  { %v2550_v15 = vpop.eup %2549  ;;  %2569 = vpow2.f32 %v2009_v38  ;;  %v1741_v29 = vadd.f32 1.0, %v2548_v10 }
 0x278   :  { %v2552_v49 = vpop.eup %2551  ;;  %2571 = vrcp.f32 %v1736_v42  ;;  %v1740_v52 = vadd.f32 1.0, %v2550_v15 }
 0x279   :  { %v2554_v48 = vpop.eup %2553  ;;  %2573 = vpow2.f32 %v2012_v20  ;;  %v1599_v20 = vadd.f32 %v3686_v53, %v3705_v44  ;;  %v1594_v53 = vadd.f32 %v3705_v44, %v3688_v56 }
 0x27a   :  { %v2556_v54 = vpop.eup %2555  ;;  %2575 = vrcp.f32 %v1739_v40 }
 0x27b   :  { %v2558_v36 = vpop.eup %2557  ;;  %2577 = vrcp.f32 %v1738_v28  ;;  %v1743_v18 = vadd.f32 1.0, %v2556_v54  ;;  %v2682_v28 = vld [vmem:[%s4032_s0 + $0x20] sm:$0xff] }
 0x27c   :  { %v2560_v17 = vpop.eup %2559  ;;  %2579 = vrcp.f32 %v1741_v29 }
 0x27d   :  { %v2562_v14 = vpop.eup %2561  ;;  %2581 = vrcp.f32 %v1740_v52  ;;  %v2018_v52 = vmul.f32 -1.442695, %v1599_v20 }
 0x27e   :  { %v2564_v34 = vpop.eup %2563  ;;  %2583 = vpow2.f32 %v2011_v8 }
 0x27f   :  { %v2566_v27 = vpop.eup %2565  ;;  %2585 = vpow2.f32 %v2014_v50  ;;  %v1742_v42 = vadd.f32 1.0, %v2564_v34  ;;  %v2685_v34 = vld [vmem:[%s4032_s0 + $0x48] sm:$0xff] }
 0x280   :  { %v2568_v46 = vpop.eup %2567  ;;  %2587 = vrcp.f32 %v1743_v18  ;;  %v1745_v40 = vadd.f32 1.0, %v2566_v27  ;;  %v2686_v27 = vld [vmem:[%s4032_s0 + $0x40] sm:$0xff] }
 0x281   :  { %v2570_v23 = vpop.eup %2569  ;;  %2589 = vpow2.f32 %v2013_v7 }
 0x282   :  { %v2572_v10 = vpop.eup %2571  ;;  %v1744_v29 = vadd.f32 1.0, %v2570_v23 }
 0x2fb   :  { %v2235_v13 = vpop.f32.mrb[16].mxu1 }
 0x2fc   :  { %v1147_v2 = vadd.f32 %v2235_v13, %v3748_v9  ;;  %v1141_v37 = vpop.f32.mrb[17].mxu1 }
 0x2fd   :  { %v1142_v55 = vadd.f32 %v3748_v9, %v1141_v37 }
 0x2fe   :  { %v1825_v41 = vmul.f32 %v2536_v57, %v1147_v2  ;;  %v2681_v2 = vld [vmem:[%s4032_s0 + $0x28] sm:$0xff] }
 0x2ff   :  { %v1824_v60 = vmul.f32 %v2540_v16, %v1142_v55  ;;  %v2238_v59 = vpop.f32.mrb[18].mxu1 }
 0x300   :  { %v1857_v35 = vadd.f32 %v2677_v25, %v1825_v41  ;;  %v1157_v45 = vadd.f32 %v2238_v59, %v3748_v9  ;;  %v1151_v5 = vpop.f32.mrb[19].mxu1  ;;  %v1609_v59 = vadd.f32 %v3690_v33, %v3705_v44  ;;  %v1604_v25 = vadd.f32 %v3705_v44, %v3692_v30 }
 0x301   :  { %v1856_v3 = vadd.f32 %v2678_v11, %v1824_v60  ;;  %v1152_v1 = vadd.f32 %v3748_v9, %v1151_v5  ;;  %v2683_v5 = vld [vmem:[%s4032_s0 + $0x38] sm:$0xff]  ;;  %v2017_v30 = vmul.f32 -1.442695, %v1594_v53 }
 0x302   :  { %1889 = vst.msk [vmem:[%s4041_s9 + $0x8] sm:$0xff] %vm64_vm0, %v1857_v35  ;;  %v1827_v4 = vmul.f32 %v2544_v51, %v1157_v45  ;;  %v2016_v51 = vmul.f32 -1.442695, %v1589_v32  ;;  %v2020_v50 = vmul.f32 -1.442695, %v1609_v59 }
 0x303   :  { %1888 = vst.msk [vmem:[%s4041_s9] sm:$0xff] %vm64_vm0, %v1856_v3  ;;  %v1826_v58 = vmul.f32 %v2552_v49, %v1152_v1  ;;  %v2241_v63 = vpop.f32.mrb[20].mxu1  ;;  %v2574_v49 = vpop.eup %2573  ;;  %v2684_v1 = vld [vmem:[%s4032_s0 + $0x30] sm:$0xff] }
 0x304   :  { %v1859_v24 = vadd.f32 %v2679_v43, %v1827_v4  ;;  %v1167_v57 = vadd.f32 %v2241_v63, %v3748_v9  ;;  %v1161_v22 = vpop.f32.mrb[21].mxu1  ;;  %2591 = vpow2.f32 %v2016_v51  ;;  %v1747_v45 = vadd.f32 1.0, %v2574_v49 }
 0x305   :  { %v1858_v26 = vadd.f32 %v2680_v62, %v1826_v58  ;;  %v1162_v16 = vadd.f32 %v3748_v9, %v1161_v22  ;;  %2593 = vrcp.f32 %v1742_v42  ;;  %v2019_v58 = vmul.f32 -1.442695, %v1604_v25  ;;  %v2690_v25 = vld [vmem:[%s4032_s0 + $0x60] sm:$0xff] }
 0x306   :  { %1891 = vst.msk [vmem:[%s4041_s9 + $0x18] sm:$0xff] %vm64_vm0, %v1859_v24  ;;  %v1829_v38 = vmul.f32 %v2554_v48, %v1167_v57  ;;  %v2576_v48 = vpop.eup %2575  ;;  %2595 = vrcp.f32 %v1745_v40  ;;  %v1619_v22 = vadd.f32 %v3694_v6, %v3705_v44  ;;  %v1629_v40 = vadd.f32 %v3698_v61, %v3705_v44 }
 0x307   :  { %1890 = vst.msk [vmem:[%s4041_s9 + $0x10] sm:$0xff] %vm64_vm0, %v1858_v26  ;;  %v1828_v19 = vmul.f32 %v2558_v36, %v1162_v16  ;;  %v2244_v13 = vpop.f32.mrb[22].mxu1  ;;  %v2578_v35 = vpop.eup %2577  ;;  %2597 = vpow2.f32 %v2015_v31  ;;  %v1614_v16 = vadd.f32 %v3705_v44, %v3696_v0  ;;  %v2687_v0 = vld [vmem:[%s4032_s0 + $0x58] sm:$0xff]  ;;  %v1624_v49 = vadd.f32 %v3705_v44, %v3700_v39  ;;  %v2689_v44 = vld [vmem:[%s4032_s0 + $0x68] sm:$0xff] }
 0x308   :  { %v1861_v37 = vadd.f32 %v2681_v2, %v1829_v38  ;;  %v1177_v15 = vadd.f32 %v2244_v13, %v3748_v9  ;;  %v1171_v55 = vpop.f32.mrb[23].mxu1  ;;  %v2580_v3 = vpop.eup %2579  ;;  %2599 = vrcp.f32 %v1744_v29 }
 0x309   :  { %v1860_v41 = vadd.f32 %v2682_v28, %v1828_v19  ;;  %v1172_v21 = vadd.f32 %v3748_v9, %v1171_v55  ;;  %2601 = vpow2.f32 %v2018_v52  ;;  %v2021_v31 = vmul.f32 -1.442695, %v1614_v16 }
 0x30a   :  { %1893 = vst.msk [vmem:[%s4041_s9 + $0x28] sm:$0xff] %vm64_vm0, %v1861_v37  ;;  %v1831_v60 = vmul.f32 %v2560_v17, %v1177_v15  ;;  %v2582_v17 = vpop.eup %2581  ;;  %2603 = vrcp.f32 %v1747_v45  ;;  %v2688_v37 = vld [vmem:[%s4032_s0 + $0x50] sm:$0xff] }
 0x30b   :  { %1892 = vst.msk [vmem:[%s4041_s9 + $0x20] sm:$0xff] %vm64_vm0, %v1860_v41  ;;  %v1830_v54 = vmul.f32 %v2562_v14, %v1172_v21  ;;  %v2247_v56 = vpop.f32.mrb[24].mxu1  ;;  %v2584_v32 = vpop.eup %2583  ;;  %2605 = vpow2.f32 %v2017_v30  ;;  %v2691_v30 = vld [vmem:[%s4032_s0 + $0x78] sm:$0xff] }
 0x30c   :  { %v1863_v33 = vadd.f32 %v2683_v5, %v1831_v60  ;;  %v1187_v36 = vadd.f32 %v2247_v56, %v3748_v9  ;;  %v1181_v11 = vpop.f32.mrb[25].mxu1  ;;  %v2586_v63 = vpop.eup %2585  ;;  %v1746_v7 = vadd.f32 1.0, %v2584_v32  ;;  %2607 = vpow2.f32 %v2020_v50 }
 0x30d   :  { %v1862_v8 = vadd.f32 %v2684_v1, %v1830_v54  ;;  %v1182_v47 = vadd.f32 %v3748_v9, %v1181_v11  ;;  %v2588_v12 = vpop.eup %2587  ;;  %v1749_v38 = vadd.f32 1.0, %v2586_v63  ;;  %2609 = vpow2.f32 %v2019_v58 }
 0x30e   :  { %1895 = vst.msk [vmem:[%s4041_s9 + $0x38] sm:$0xff] %vm64_vm0, %v1863_v33  ;;  %v1833_v4 = vmul.f32 %v2568_v46, %v1187_v36  ;;  %v2590_v6 = vpop.eup %2589  ;;  %2611 = vrcp.f32 %v1746_v7  ;;  %v2024_v56 = vmul.f32 -1.442695, %v1629_v40  ;;  %v2023_v5 = vmul.f32 -1.442695, %v1624_v49 }
 0x30f   :  { %1894 = vst.msk [vmem:[%s4041_s9 + $0x30] sm:$0xff] %vm64_vm0, %v1862_v8  ;;  %v1832_v14 = vmul.f32 %v2572_v10, %v1182_v47  ;;  %v2250_v18 = vpop.f32.mrb[26].mxu1  ;;  %v2592_v42 = vpop.eup %2591  ;;  %v2022_v10 = vmul.f32 -1.442695, %v1619_v22  ;;  %v1748_v41 = vadd.f32 1.0, %v2590_v6  ;;  %2613 = vrcp.f32 %v1749_v38 }
 0x310   :  { %v1865_v43 = vadd.f32 %v2685_v34, %v1833_v4  ;;  %v1197_v24 = vadd.f32 %v2250_v18, %v3748_v9  ;;  %v1191_v57 = vpop.f32.mrb[27].mxu1  ;;  %v2594_v2 = vpop.eup %2593  ;;  %v1751_v53 = vadd.f32 1.0, %v2592_v42  ;;  %v2692_v18 = vld [vmem:[%s4032_s0 + $0x70] sm:$0xff] }
 0x311   :  { %v1864_v62 = vadd.f32 %v2686_v27, %v1832_v14  ;;  %v1192_v26 = vadd.f32 %v3748_v9, %v1191_v57  ;;  %v2596_v28 = vpop.eup %2595  ;;  %2615 = vpow2.f32 %v2022_v10  ;;  %v2695_v10 = vld [vmem:[%s4032_s0 + $0x98] sm:$0xff] }
 0x312   :  { %1897 = vst.msk [vmem:[%s4041_s9 + $0x48] sm:$0xff] %vm64_vm0, %v1865_v43  ;;  %v1835_v46 = vmul.f32 %v2576_v48, %v1197_v24  ;;  %v2598_v21 = vpop.eup %2597  ;;  %2617 = vpow2.f32 %v2021_v31  ;;  %v2696_v31 = vld [vmem:[%s4032_s0 + $0x90] sm:$0xff] }
 0x313   :  { %1896 = vst.msk [vmem:[%s4041_s9 + $0x40] sm:$0xff] %vm64_vm0, %v1864_v62  ;;  %v1834_v51 = vmul.f32 %v2578_v35, %v1192_v26  ;;  %v2253_v23 = vpop.f32.mrb[28].mxu1  ;;  %v2600_v39 = vpop.eup %2599  ;;  %2619 = vrcp.f32 %v1748_v41  ;;  %v1750_v36 = vadd.f32 1.0, %v2598_v21 }
 0x314   :  { %v1867_v19 = vadd.f32 %v2687_v0, %v1835_v46  ;;  %v1207_v13 = vadd.f32 %v2253_v23, %v3748_v9  ;;  %v1201_v20 = vpop.f32.mrb[29].mxu1  ;;  %v2602_v52 = vpop.eup %2601  ;;  %2621 = vrcp.f32 %v1751_v53  ;;  %v2694_v46 = vld [vmem:[%s4032_s0 + $0x80] sm:$0xff] }
 0x315   :  { %v1866_v15 = vadd.f32 %v2688_v37, %v1834_v51  ;;  %v1202_v55 = vadd.f32 %v3748_v9, %v1201_v20  ;;  %v2604_v33 = vpop.eup %2603  ;;  %2623 = vpow2.f32 %v2024_v56  ;;  %v1753_v14 = vadd.f32 1.0, %v2602_v52  ;;  %v2698_v52 = vld [vmem:[%s4032_s0 + $0xa0] sm:$0xff] }
 0x316   :  { %1899 = vst.msk [vmem:[%s4041_s9 + $0x58] sm:$0xff] %vm64_vm0, %v1867_v19  ;;  %v1837_v61 = vmul.f32 %v2580_v3, %v1207_v13  ;;  %v2606_v3 = vpop.eup %2605  ;;  %2625 = vpow2.f32 %v2023_v5 }
 0x317   :  { %1898 = vst.msk [vmem:[%s4041_s9 + $0x50] sm:$0xff] %vm64_vm0, %v1866_v15  ;;  %v1836_v48 = vmul.f32 %v2582_v17, %v1202_v55  ;;  %v2256_v29 = vpop.f32.mrb[30].mxu1  ;;  %v2608_v47 = vpop.eup %2607  ;;  %2627 = vrcp.f32 %v1750_v36  ;;  %v1752_v34 = vadd.f32 1.0, %v2606_v3 }
 0x318   :  { %v1869_v60 = vadd.f32 %v2689_v44, %v1837_v61  ;;  %v1217_v59 = vadd.f32 %v2256_v29, %v3748_v9  ;;  %v1211_v54 = vpop.f32.mrb[31].mxu1  ;;  %v2610_v32 = vpop.eup %2609  ;;  %2629 = vrcp.f32 %v1753_v14  ;;  %v1755_v7 = vadd.f32 1.0, %v2608_v47  ;;  %v2697_v44 = vld [vmem:[%s4032_s0 + $0xa8] sm:$0xff] }
 0x319   :  { %v1868_v35 = vadd.f32 %v2690_v25, %v1836_v48  ;;  %v1212_v45 = vadd.f32 %v3748_v9, %v1211_v54  ;;  %v2612_v22 = vpop.eup %2611  ;;  %2631 = vrcp.f32 %v1752_v34  ;;  %v1754_v23 = vadd.f32 1.0, %v2610_v32  ;;  %v2701_v34 = vld [vmem:[%s4032_s0 + $0xc8] sm:$0xff] }
 0x31a   :  { %1901 = vst.msk [vmem:[%s4041_s9 + $0x68] sm:$0xff] %vm64_vm0, %v1869_v60  ;;  %v1839_v11 = vmul.f32 %v2588_v12, %v1217_v59  ;;  %v2693_v12 = vld [vmem:[%s4032_s0 + $0x88] sm:$0xff]  ;;  %v2614_v16 = vpop.eup %2613  ;;  %2633 = vrcp.f32 %v1755_v7 }
 0x31b   :  { %1900 = vst.msk [vmem:[%s4041_s9 + $0x60] sm:$0xff] %vm64_vm0, %v1868_v35  ;;  %v1838_v1 = vmul.f32 %v2594_v2, %v1212_v45  ;;  %v2259_v8 = vpop.f32.mrb[32].mxu1  ;;  %v2616_v51 = vpop.eup %2615  ;;  %2635 = vrcp.f32 %v1754_v23 }
 0x31c   :  { %v1871_v17 = vadd.f32 %v2691_v30, %v1839_v11  ;;  %v1227_v4 = vadd.f32 %v2259_v8, %v3748_v9  ;;  %v1221_v50 = vpop.f32.mrb[33].mxu1  ;;  %v2618_v0 = vpop.eup %2617  ;;  %v1757_v55 = vadd.f32 1.0, %v2616_v51 }
 0x31d   :  { %v1870_v58 = vadd.f32 %v2692_v18, %v1838_v1  ;;  %v1222_v63 = vadd.f32 %v3748_v9, %v1221_v50  ;;  %v2620_v20 = vpop.eup %2619  ;;  %v1756_v61 = vadd.f32 1.0, %v2618_v0  ;;  %v2699_v1 = vld [vmem:[%s4032_s0 + $0xb8] sm:$0xff] }
 0x31e   :  { %1903 = vst.msk [vmem:[%s4041_s9 + $0x78] sm:$0xff] %vm64_vm0, %v1871_v17  ;;  %v1841_v43 = vmul.f32 %v2596_v28, %v1227_v4  ;;  %v2622_v15 = vpop.eup %2621  ;;  %2637 = vrcp.f32 %v1757_v55  ;;  %v2700_v17 = vld [vmem:[%s4032_s0 + $0xb0] sm:$0xff] }
 0x31f   :  { %1902 = vst.msk [vmem:[%s4041_s9 + $0x70] sm:$0xff] %vm64_vm0, %v1870_v58  ;;  %v1840_v24 = vmul.f32 %v2600_v39, %v1222_v63  ;;  %v2262_v57 = vpop.f32.mrb[34].mxu1  ;;  %v2624_v41 = vpop.eup %2623  ;;  %2639 = vrcp.f32 %v1756_v61 }
 0x320   :  { %v1873_v27 = vadd.f32 %v2693_v12, %v1841_v43  ;;  %v1237_v62 = vadd.f32 %v2262_v57, %v3748_v9  ;;  %v1231_v26 = vpop.f32.mrb[35].mxu1  ;;  %v2626_v53 = vpop.eup %2625  ;;  %v1759_v56 = vadd.f32 1.0, %v2624_v41 }
 0x321   :  { %v1872_v6 = vadd.f32 %v2694_v46, %v1840_v24  ;;  %v1232_v38 = vadd.f32 %v3748_v9, %v1231_v26  ;;  %v2628_v39 = vpop.eup %2627  ;;  %v1758_v45 = vadd.f32 1.0, %v2626_v53  ;;  %v2707_v53 = vld [vmem:[%s4032_s0 + $0xf8] sm:$0xff] }
 0x322   :  { %1905 = vst.msk [vmem:[%s4041_s9 + $0x88] sm:$0xff] %vm64_vm0, %v1873_v27  ;;  %v1843_v42 = vmul.f32 %v2604_v33, %v1237_v62  ;;  %v2630_v33 = vpop.eup %2629  ;;  %2641 = vrcp.f32 %v1759_v56 }
 0x323   :  { %1904 = vst.msk [vmem:[%s4041_s9 + $0x80] sm:$0xff] %vm64_vm0, %v1872_v6  ;;  %v1842_v19 = vmul.f32 %v2612_v22, %v1232_v38  ;;  %v2265_v13 = vpop.f32.mrb[36].mxu1  ;;  %v2632_v3 = vpop.eup %2631  ;;  %2643 = vrcp.f32 %v1758_v45  ;;  %v2702_v22 = vld [vmem:[%s4032_s0 + $0xc0] sm:$0xff]  ;;  %v2703_v6 = vld [vmem:[%s4032_s0 + $0xd8] sm:$0xff] }
 0x324   :  { %v1875_v40 = vadd.f32 %v2695_v10, %v1843_v42  ;;  %v1247_v2 = vadd.f32 %v2265_v13, %v3748_v9  ;;  %v1241_v37 = vpop.f32.mrb[37].mxu1  ;;  %v2634_v14 = vpop.eup %2633  ;;  %v2704_v42 = vld [vmem:[%s4032_s0 + $0xd0] sm:$0xff] }
 0x325   :  { %v1874_v49 = vadd.f32 %v2696_v31, %v1842_v19  ;;  %v1242_v28 = vadd.f32 %v3748_v9, %v1241_v37  ;;  %v2636_v63 = vpop.eup %2635  ;;  %v2705_v37 = vld [vmem:[%s4032_s0 + $0xe8] sm:$0xff] }
 0x326   :  { %1907 = vst.msk [vmem:[%s4041_s9 + $0x98] sm:$0xff] %vm64_vm0, %v1875_v40  ;;  %v1845_v21 = vmul.f32 %v2614_v16, %v1247_v2 }
 0x327   :  { %1906 = vst.msk [vmem:[%s4041_s9 + $0x90] sm:$0xff] %vm64_vm0, %v1874_v49  ;;  %v1844_v48 = vmul.f32 %v2620_v20, %v1242_v28  ;;  %v2268_v29 = vpop.f32.mrb[38].mxu1  ;;  %v2706_v49 = vld [vmem:[%s4032_s0 + $0xe0] sm:$0xff] }
 0x328   :  { %v1877_v60 = vadd.f32 %v2697_v44, %v1845_v21  ;;  %v1257_v59 = vadd.f32 %v2268_v29, %v3748_v9  ;;  %v1251_v54 = vpop.f32.mrb[39].mxu1  ;;  %v2638_v26 = vpop.eup %2637 }
 0x329   :  { %v1876_v25 = vadd.f32 %v2698_v52, %v1844_v48  ;;  %v1252_v35 = vadd.f32 %v3748_v9, %v1251_v54  ;;  %v2640_v46 = vpop.eup %2639 }
 0x32a   :  { %1909 = vst.msk [vmem:[%s4041_s9 + $0xa8] sm:$0xff] %vm64_vm0, %v1877_v60  ;;  %v1847_v5 = vmul.f32 %v2622_v15, %v1257_v59 }
 0x32b   :  { %1908 = vst.msk [vmem:[%s4041_s9 + $0xa0] sm:$0xff] %vm64_vm0, %v1876_v25  ;;  %v1846_v36 = vmul.f32 %v2628_v39, %v1252_v35  ;;  %v2271_v11 = vpop.f32.mrb[40].mxu1 }
 0x32c   :  { %v1879_v8 = vadd.f32 %v2699_v1, %v1847_v5  ;;  %v1267_v47 = vadd.f32 %v2271_v11, %v3748_v9  ;;  %v1261_v30 = vpop.f32.mrb[41].mxu1  ;;  %v2642_v20 = vpop.eup %2641 }
 0x32d   :  { %v1878_v4 = vadd.f32 %v2700_v17, %v1846_v36  ;;  %v1262_v50 = vadd.f32 %v3748_v9, %v1261_v30  ;;  %v2644_v2 = vpop.eup %2643 }
 0x32e   :  { %1911 = vst.msk [vmem:[%s4041_s9 + $0xb8] sm:$0xff] %vm64_vm0, %v1879_v8  ;;  %v1849_v32 = vmul.f32 %v2630_v33, %v1267_v47 }
 0x32f   :  { %1910 = vst.msk [vmem:[%s4041_s9 + $0xb0] sm:$0xff] %vm64_vm0, %v1878_v4  ;;  %v1848_v18 = vmul.f32 %v2632_v3, %v1262_v50  ;;  %v2274_v58 = vpop.f32.mrb[42].mxu1 }
 0x330   :  { %v1881_v43 = vadd.f32 %v2701_v34, %v1849_v32  ;;  %v1277_v24 = vadd.f32 %v2274_v58, %v3748_v9  ;;  %v1271_v57 = vpop.f32.mrb[43].mxu1 }
 0x331   :  { %v1880_v12 = vadd.f32 %v2702_v22, %v1848_v18  ;;  %v1272_v27 = vadd.f32 %v3748_v9, %v1271_v57 }
 0x332   :  { %1913 = vst.msk [vmem:[%s4041_s9 + $0xc8] sm:$0xff] %vm64_vm0, %v1881_v43  ;;  %v1851_v62 = vmul.f32 %v2634_v14, %v1277_v24 }
 0x333   :  { %1912 = vst.msk [vmem:[%s4041_s9 + $0xc0] sm:$0xff] %vm64_vm0, %v1880_v12  ;;  %v1850_v16 = vmul.f32 %v2636_v63, %v1272_v27  ;;  %v2277_v7 = vpop.f32.mrb[44].mxu1 }
 0x334   :  { %v1883_v38 = vadd.f32 %v2703_v6, %v1851_v62  ;;  %v1287_v51 = vadd.f32 %v2277_v7, %v3748_v9  ;;  %v1281_v23 = vpop.f32.mrb[45].mxu1 }
 0x335   :  { %v1882_v0 = vadd.f32 %v2704_v42, %v1850_v16  ;;  %v1282_v19 = vadd.f32 %v3748_v9, %v1281_v23 }
 0x336   :  { %1915 = vst.msk [vmem:[%s4041_s9 + $0xd8] sm:$0xff] %vm64_vm0, %v1883_v38  ;;  %v1853_v13 = vmul.f32 %v2638_v26, %v1287_v51 }
 0x337   :  { %1914 = vst.msk [vmem:[%s4041_s9 + $0xd0] sm:$0xff] %vm64_vm0, %v1882_v0  ;;  %v1852_v10 = vmul.f32 %v2640_v46, %v1282_v19  ;;  %v2280_v40 = vpop.f32.mrb[46].mxu1 }
 0x338   :  { %v1885_v15 = vadd.f32 %v2705_v37, %v1853_v13  ;;  %v1297_v55 = vadd.f32 %v2280_v40, %v3748_v9  ;;  %v1291_v31 = vpop.f32.mrb[47].mxu1 }
 0x339   :  { %v1884_v28 = vadd.f32 %v2706_v49, %v1852_v10  ;;  %v1292_v41 = vadd.f32 %v3748_v9, %v1291_v31  ;;  %v2708_v9 = vld [vmem:[%s4032_s0 + $0xf0] sm:$0xff] }
 0x33a   :  { %1917 = vst.msk [vmem:[%s4041_s9 + $0xe8] sm:$0xff] %vm64_vm0, %v1885_v15  ;;  %v1855_v61 = vmul.f32 %v2642_v20, %v1297_v55 }
 0x33b   :  { %1916 = vst.msk [vmem:[%s4041_s9 + $0xe0] sm:$0xff] %vm64_vm0, %v1884_v28  ;;  %v1854_v21 = vmul.f32 %v2644_v2, %v1292_v41 }
 0x33c   :  { %v1887_v48 = vadd.f32 %v2707_v53, %v1855_v61 }
 0x33d   :  { %v1886_v29 = vadd.f32 %v2708_v9, %v1854_v21 }
 0x33e   :  { %1919 = vst.msk [vmem:[%s4041_s9 + $0xf8] sm:$0xff] %vm64_vm0, %v1887_v48 }
 0x33f   :  { %1918 = vst.msk [vmem:[%s4041_s9 + $0xf0] sm:$0xff] %vm64_vm0, %v1886_v29 }

</bundles_post_ra>
